<compile_context>
chip_gen: v7x
topology: tpu7x:2x2x1
jax: 0.10.0
libtpu: 0.0.40
codegen_flags: <defaults>
</compile_context>

<pallas_src>
import math

import jax
import jax.numpy as jnp
from jax.experimental import pallas as pl
from jax.experimental.pallas import tpu as pltpu


_BUFFERED = getattr(pl, "Buffered", None)
# Above the v5e 16 MiB default scoped limit, comfortably inside v7x's 64 MiB.
_VMEM_LIMIT_BYTES = 48 * 1024 * 1024


# ---------------------------------------------------------------------------
# Kernel bodies
# ---------------------------------------------------------------------------

def _attn_heads(q_bf, kv_bf, ctx_ref, probs_ref, bt, *, num_heads, head_dim,
                with_probs):
    """Multi-head attention core for one batch element.

    q_bf:  (Sq, H)  bf16  -- Q projection, 1/sqrt(head_dim) already folded in.
    kv_bf: (Skv, 2H) bf16 -- [K | V] projections.
    Per-head contexts are stored into ctx_ref[:Sq, :] (f32 VMEM scratch slab);
    returns the assembled (Sq, H) context in bf16.
    """
    Sq = q_bf.shape[0]
    H = num_heads * head_dim

    for h in range(num_heads):   # static unroll; heads are contiguous column slices
        lo, hi = h * head_dim, (h + 1) * head_dim
        q = q_bf[:, lo:hi]                       # (Sq, hd)
        k = kv_bf[:, lo:hi]                      # (Skv, hd)
        v = kv_bf[:, H + lo:H + hi]              # (Skv, hd)

        # scores: contract head_dim (no explicit transpose materialized)
        s = jnp.einsum('qd,kd->qk', q, k,
                       preferred_element_type=jnp.float32)     # (Sq, Skv) f32

        # numerically stable softmax in f32; reciprocal issues on the EUP slot
        m = jnp.max(s, axis=-1, keepdims=True)
        e = jnp.exp(s - m)
        p = e * pl.reciprocal(jnp.sum(e, axis=-1, keepdims=True), approx=True)

        if with_probs:
            probs_ref[bt, h] = p                 # f32 write, vis path only

        # write this head's context directly into its column slice of the slab
        ctx_ref[0:Sq, lo:hi] = jnp.dot(p.astype(jnp.bfloat16), v,
                                       preferred_element_type=jnp.float32)

    return ctx_ref[0:Sq, :].astype(jnp.bfloat16)       # one wide cast


def _make_self_attn_kernel(num_heads, head_dim, block_b, with_probs):
    H = num_heads * head_dim

    def kernel(x_ref, wqkv_ref, bqkv_ref, wo_ref, bo_ref, out_ref, *rest):
        if with_probs:
            probs_ref, ctx_ref = rest
        else:
            (ctx_ref,) = rest
            probs_ref = None

        wqkv = wqkv_ref[...]     # bf16, grid-invariant (hoisted out of bt loop)
        wo = wo_ref[...]         # bf16
        bqkv = bqkv_ref[...]     # f32 (1, 3H)
        bo = bo_ref[...]         # f32 (1, H)

        for bt in range(block_b):
            x = x_ref[bt].astype(jnp.bfloat16)                       # (S, H)
            qkv = jnp.dot(x, wqkv, preferred_element_type=jnp.float32) + bqkv
            qkv_bf = qkv.astype(jnp.bfloat16)                        # (S, 3H), one cast
            ctx = _attn_heads(qkv_bf[:, :H], qkv_bf[:, H:], ctx_ref, probs_ref,
                              bt, num_heads=num_heads, head_dim=head_dim,
                              with_probs=with_probs)
            out = jnp.dot(ctx, wo, preferred_element_type=jnp.float32) + bo
            out_ref[bt] = out.astype(out_ref.dtype)

    return kernel


def _make_cross_attn_kernel(num_heads, head_dim, block_b, with_probs):
    """Fused kernel computing BOTH cross-attention directions in one pass."""
    H = num_heads * head_dim

    def kernel(xq_ref, xkv_ref, wqkv_ref, bqkv_ref, wo_ref, bo_ref,
               out1_ref, out2_ref, *rest):
        if with_probs:
            probs_ref, ctx_ref = rest
        else:
            (ctx_ref,) = rest
            probs_ref = None

        wqkv = wqkv_ref[...]
        wo = wo_ref[...]
        bqkv = bqkv_ref[...]
        bo = bo_ref[...]

        for bt in range(block_b):
            xa = xq_ref[bt].astype(jnp.bfloat16)          # (Sq, H)
            xb = xkv_ref[bt].astype(jnp.bfloat16)         # (Skv, H)
            # one wide projection per input gives [Q | K | V] reused by BOTH
            # attention directions
            pa = (jnp.dot(xa, wqkv, preferred_element_type=jnp.float32)
                  + bqkv).astype(jnp.bfloat16)            # (Sq, 3H)
            pb = (jnp.dot(xb, wqkv, preferred_element_type=jnp.float32)
                  + bqkv).astype(jnp.bfloat16)            # (Skv, 3H)

            # direction 1: Q from xq, K/V from xkv (probs materialized if vis)
            ctx1 = _attn_heads(pa[:, :H], pb[:, H:], ctx_ref, probs_ref, bt,
                               num_heads=num_heads, head_dim=head_dim,
                               with_probs=with_probs)
            out1 = jnp.dot(ctx1, wo, preferred_element_type=jnp.float32) + bo
            out1_ref[bt] = out1.astype(out1_ref.dtype)

            # direction 2: Q from xkv, K/V from xq (probs discarded)
            ctx2 = _attn_heads(pb[:, :H], pa[:, H:], ctx_ref, None, bt,
                               num_heads=num_heads, head_dim=head_dim,
                               with_probs=False)
            out2 = jnp.dot(ctx2, wo, preferred_element_type=jnp.float32) + bo
            out2_ref[bt] = out2.astype(out2_ref.dtype)

    return kernel


# ---------------------------------------------------------------------------
# pallas_call wrappers
# ---------------------------------------------------------------------------

def _invariant_spec(shape, single_buffer):
    """Grid-invariant operand (weights / biases): constant block index.

    When supported, request single-buffering (pl.Buffered(1)) so invariant
    blocks are not double-buffered in VMEM.
    """
    nd = len(shape)
    idx = lambda b, _nd=nd: (0,) * _nd
    if single_buffer and _BUFFERED is not None:
        try:
            return pl.BlockSpec(shape, idx, pipeline_mode=_BUFFERED(1))
        except Exception:
            pass
    return pl.BlockSpec(shape, idx)


def _pick_block_b(B, sq, skv, h, num_heads, budget_bytes=4 << 20):
    """Largest divisor of B whose per-step activation footprint fits a budget."""
    per = 4 * (sq * 3 * h + skv * 3 * h + num_heads * sq * skv + (sq + skv) * h)
    bb = int(max(1, min(B, budget_bytes // max(per, 1))))
    while B % bb:
        bb -= 1
    return bb


def _self_attention_call(packed, x, num_heads, with_probs):
    B, S, H = x.shape
    head_dim = H // num_heads
    block_b = _pick_block_b(B, S, S, H, num_heads)
    grid = (B // block_b,)

    kernel = _make_self_attn_kernel(num_heads, head_dim, block_b, with_probs)

    out_shape = [jax.ShapeDtypeStruct((B, S, H), x.dtype)]
    out_specs = [pl.BlockSpec((block_b, S, H), lambda b: (b, 0, 0))]
    if with_probs:
        out_shape.append(jax.ShapeDtypeStruct((B, num_heads, S, S), jnp.float32))
        out_specs.append(pl.BlockSpec((block_b, num_heads, S, S),
                                      lambda b: (b, 0, 0, 0)))

    def build(single_buffer):
        return pl.pallas_call(
            kernel,
            out_shape=tuple(out_shape),
            grid_spec=pltpu.PrefetchScalarGridSpec(
                num_scalar_prefetch=0,
                grid=grid,
                in_specs=[pl.BlockSpec((block_b, S, H), lambda b: (b, 0, 0)),
                          _invariant_spec((H, 3 * H), single_buffer),
                          _invariant_spec((1, 3 * H), single_buffer),
                          _invariant_spec((H, H), single_buffer),
                          _invariant_spec((1, H), single_buffer)],
                out_specs=out_specs,
                scratch_shapes=[pltpu.VMEM((S, H), jnp.float32)],   # ctx slab
            ),
            compiler_params=pltpu.CompilerParams(
                dimension_semantics=("parallel",),
                vmem_limit_bytes=_VMEM_LIMIT_BYTES),
        )

    args = (x, packed["wqkv"], packed["bqkv"], packed["wo"], packed["bo"])
    try:
        results = jax.block_until_ready(build(True)(*args))
    except Exception:
        # pl.Buffered(1) unsupported in this build -> default double-buffering
        results = build(False)(*args)

    if not isinstance(results, (tuple, list)):
        results = (results,)
    return results[0], (results[1] if with_probs else None)


def _cross_attention_call(packed, xq, xkv, num_heads, with_probs):
    B, Sq, H = xq.shape
    Skv = xkv.shape[1]
    head_dim = H // num_heads
    block_b = _pick_block_b(B, Sq, Skv, H, num_heads)
    grid = (B // block_b,)
    smax = max(Sq, Skv)

    kernel = _make_cross_attn_kernel(num_heads, head_dim, block_b, with_probs)

    out_shape = [jax.ShapeDtypeStruct((B, Sq, H), xq.dtype),
                 jax.ShapeDtypeStruct((B, Skv, H), xkv.dtype)]
    out_specs = [pl.BlockSpec((block_b, Sq, H), lambda b: (b, 0, 0)),
                 pl.BlockSpec((block_b, Skv, H), lambda b: (b, 0, 0))]
    if with_probs:
        out_shape.append(jax.ShapeDtypeStruct((B, num_heads, Sq, Skv),
                                              jnp.float32))
        out_specs.append(pl.BlockSpec((block_b, num_heads, Sq, Skv),
                                      lambda b: (b, 0, 0, 0)))

    def build(single_buffer):
        return pl.pallas_call(
            kernel,
            out_shape=tuple(out_shape),
            grid_spec=pltpu.PrefetchScalarGridSpec(
                num_scalar_prefetch=0,
                grid=grid,
                in_specs=[pl.BlockSpec((block_b, Sq, H), lambda b: (b, 0, 0)),
                          pl.BlockSpec((block_b, Skv, H), lambda b: (b, 0, 0)),
                          _invariant_spec((H, 3 * H), single_buffer),
                          _invariant_spec((1, 3 * H), single_buffer),
                          _invariant_spec((H, H), single_buffer),
                          _invariant_spec((1, H), single_buffer)],
                out_specs=out_specs,
                scratch_shapes=[pltpu.VMEM((smax, H), jnp.float32)],   # ctx slab
            ),
            compiler_params=pltpu.CompilerParams(
                dimension_semantics=("parallel",),
                vmem_limit_bytes=_VMEM_LIMIT_BYTES),
        )

    args = (xq, xkv, packed["wqkv"], packed["bqkv"], packed["wo"], packed["bo"])
    try:
        results = jax.block_until_ready(build(True)(*args))
    except Exception:
        results = build(False)(*args)

    out1, out2 = results[0], results[1]
    probs = results[2] if with_probs else None
    return out1, out2, probs


def attention_forward(packed, *inputs, num_heads, vis=False):
    """Mirrors Attention.forward semantics (eval mode, dropout = identity)."""
    if len(inputs) == 1:
        x = inputs[0]
        out, probs = _self_attention_call(packed, x, num_heads, with_probs=vis)
        return out, None, (probs if vis else None)
    elif len(inputs) == 2:
        q_in, kv_in = inputs
        out1, out2, probs = _cross_attention_call(packed, q_in, kv_in, num_heads,
                                                  with_probs=vis)
        return out1, out2, (probs if vis else None)
    else:
        raise ValueError('Attention forward expects 1 or 2 input tensors.')


# ---------------------------------------------------------------------------
# Params (raw nn.Linear-style) + one-time packing + pure-JAX reference
# ---------------------------------------------------------------------------

def init_params(key, hidden_size):
    """Deterministic init matching nn.Linear shapes; weights stored as (in, out)."""
    ks = jax.random.split(key, 8)
    bound = 1.0 / math.sqrt(hidden_size)

    def lin(kw, kb):
        w = jax.random.uniform(kw, (hidden_size, hidden_size), jnp.float32,
                               -bound, bound)
        b = jax.random.uniform(kb, (1, hidden_size), jnp.float32, -bound, bound)
        return w, b

    wq, bq = lin(ks[0], ks[1])
    wk, bk = lin(ks[2], ks[3])
    wv, bv = lin(ks[4], ks[5])
    wo, bo = lin(ks[6], ks[7])
    return dict(wq=wq, bq=bq, wk=wk, bk=bk, wv=wv, bv=bv, wo=wo, bo=bo)


def pack_params(params, num_heads):
    """One-time packing for the kernel: fused [Q|K|V] weights, bf16 pre-cast,
    and the 1/sqrt(head_dim) softmax scale folded into the Q projection."""
    H = params["wq"].shape[0]
    if H % num_heads != 0:
        raise ValueError(f"hidden_size {H} not divisible by num_heads {num_heads}")
    head_dim = H // num_heads
    scale = 1.0 / math.sqrt(head_dim)
    wqkv = jnp.concatenate([params["wq"] * scale, params["wk"], params["wv"]],
                           axis=1)                        # (H, 3H)
    bqkv = jnp.concatenate([params["bq"] * scale, params["bk"], params["bv"]],
                           axis=1)                        # (1, 3H)
    return dict(
        wqkv=wqkv.astype(jnp.bfloat16),                   # bf16 weights
        bqkv=bqkv.astype(jnp.float32),                    # f32 biases
        wo=params["wo"].astype(jnp.bfloat16),
        bo=params["bo"].astype(jnp.float32),
    )


def _reference(params, xq, xkv, num_heads):
    """Pure-JAX f32 reference for validation."""
    B, Sq, H = xq.shape
    hd = H // num_heads
    q = xq @ params["wq"] + params["bq"][0]
    k = xkv @ params["wk"] + params["bk"][0]
    v = xkv @ params["wv"] + params["bv"][0]

    def split(t):
        b, s, _ = t.shape
        return t.reshape(b, s, num_heads, hd).transpose(0, 2, 1, 3)

    qh, kh, vh = split(q), split(k), split(v)
    scores = jnp.einsum('bhqd,bhkd->bhqk', qh, kh) / math.sqrt(hd)
    probs = jax.nn.softmax(scores, axis=-1)
    ctx = jnp.einsum('bhqk,bhkd->bhqd', probs, vh)
    ctx = ctx.transpose(0, 2, 1, 3).reshape(B, Sq, H)
    out = ctx @ params["wo"] + params["bo"][0]
    return out, probs


# ---------------------------------------------------------------------------
# Smoke test
# ---------------------------------------------------------------------------

if __name__ == "__main__":
    # Small config consistent with the module: hidden_size=32, num_heads=4
    B, S, H = 2, 8, 32
    NUM_HEADS = 4

    key = jax.random.PRNGKey(0)
    k_param, k_x, k_y = jax.random.split(key, 3)
    raw_params = init_params(k_param, H)
    packed = pack_params(raw_params, NUM_HEADS)
    x = jax.random.normal(k_x, (B, S, H), jnp.float32)

    # Kernel uses bf16 MXU inputs with f32 accumulation -> compare against the
    # f32 reference at bf16-level tolerances.
    RTOL = ATOL = 2e-2

    # --- self-attention path (vis=True: probs output materialized) ---
    out, none_out, attn = attention_forward(packed, x, num_heads=NUM_HEADS, vis=True)
    out = jax.block_until_ready(out)
    attn = jax.block_until_ready(attn)
    assert none_out is None

    ref_out, ref_probs = _reference(raw_params, x, x, NUM_HEADS)
    assert jnp.allclose(out, ref_out, rtol=RTOL, atol=ATOL), "self-attn output mismatch"
    assert jnp.allclose(attn, ref_probs, rtol=RTOL, atol=ATOL), "self-attn probs mismatch"

    # --- cross-attention path (vis=False: no probs output compiled) ---
    y = jax.random.normal(k_y, (B, S, H), jnp.float32)
    out1, out2, attn_c = attention_forward(packed, x, y, num_heads=NUM_HEADS, vis=False)
    out1 = jax.block_until_ready(out1)
    out2 = jax.block_until_ready(out2)
    assert attn_c is None

    ref1, _ = _reference(raw_params, x, y, NUM_HEADS)
    ref2, _ = _reference(raw_params, y, x, NUM_HEADS)
    assert jnp.allclose(out1, ref1, rtol=RTOL, atol=ATOL), "cross-attn out1 mismatch"
    assert jnp.allclose(out2, ref2, rtol=RTOL, atol=ATOL), "cross-attn out2 mismatch"

    print("KERNEL_OK")
</pallas_src>

<mosaic_0001>
module attributes {stable_mosaic.version = 11 : i64} {
  func.func @kernel(%arg0: i32, %arg1: memref<2x8x32xf32, #tpu.memory_space<vmem>>, %arg2: memref<32x96xbf16, #tpu.memory_space<vmem>>, %arg3: memref<1x96xf32, #tpu.memory_space<vmem>>, %arg4: memref<32x32xbf16, #tpu.memory_space<vmem>>, %arg5: memref<1x32xf32, #tpu.memory_space<vmem>>, %arg6: memref<2x8x32xf32, #tpu.memory_space<vmem>>, %arg7: memref<2x4x8x8xf32, #tpu.memory_space<vmem>>, %arg8: memref<8x32xf32, #tpu.memory_space<vmem>>) attributes {dimension_semantics = [#tpu.dimension_semantics<parallel>], iteration_bounds = array<i64: 1>, scalar_prefetch = 0 : i64, scratch_operands = 1 : i64, tpu.core_type = #tpu.core_type<tc>, window_params = [{transform_indices = @transform_0, window_bounds = array<i64: 2, 8, 32>}, {pipeline_mode = #tpu.pipeline_mode<synchronous>, transform_indices = @transform_1, window_bounds = array<i64: 32, 96>}, {pipeline_mode = #tpu.pipeline_mode<synchronous>, transform_indices = @transform_2, window_bounds = array<i64: 1, 96>}, {pipeline_mode = #tpu.pipeline_mode<synchronous>, transform_indices = @transform_3, window_bounds = array<i64: 32, 32>}, {pipeline_mode = #tpu.pipeline_mode<synchronous>, transform_indices = @transform_4, window_bounds = array<i64: 1, 32>}, {transform_indices = @transform_5, window_bounds = array<i64: 2, 8, 32>}, {transform_indices = @transform_6, window_bounds = array<i64: 2, 4, 8, 8>}]} {
    %c0 = arith.constant 0 : index
    %c0_0 = arith.constant 0 : index
    %0 = vector.load %arg2[%c0, %c0_0] : memref<32x96xbf16, #tpu.memory_space<vmem>>, vector<32x96xbf16>
    %c0_1 = arith.constant 0 : index
    %c0_2 = arith.constant 0 : index
    %1 = vector.load %arg4[%c0_1, %c0_2] : memref<32x32xbf16, #tpu.memory_space<vmem>>, vector<32x32xbf16>
    %c0_3 = arith.constant 0 : index
    %c0_4 = arith.constant 0 : index
    %2 = vector.load %arg3[%c0_3, %c0_4] : memref<1x96xf32, #tpu.memory_space<vmem>>, vector<1x96xf32>
    %c0_5 = arith.constant 0 : index
    %c0_6 = arith.constant 0 : index
    %3 = vector.load %arg5[%c0_5, %c0_6] : memref<1x32xf32, #tpu.memory_space<vmem>>, vector<1x32xf32>
    %c0_7 = arith.constant 0 : index
    %c0_8 = arith.constant 0 : index
    %c0_9 = arith.constant 0 : index
    %4 = vector.load %arg1[%c0_7, %c0_8, %c0_9] : memref<2x8x32xf32, #tpu.memory_space<vmem>>, vector<1x8x32xf32>
    %5 = vector.shape_cast %4 : vector<1x8x32xf32> to vector<8x32xf32>
    %6 = arith.truncf %5 : vector<8x32xf32> to vector<8x32xbf16>
    %cst = arith.constant dense<0.000000e+00> : vector<8x96xf32>
    %7 = tpu.matmul %6, %0, %cst {dimension_numbers = #tpu.dot_dimension_numbers<[1], [0], [0], [1], [0, 0, 1, 1], [], []>} : vector<8x32xbf16>, vector<32x96xbf16>, vector<8x96xf32> -> vector<8x96xf32>
    %8 = vector.broadcast %2 : vector<1x96xf32> to vector<8x96xf32>
    %9 = arith.addf %7, %8 : vector<8x96xf32>
    %10 = arith.truncf %9 : vector<8x96xf32> to vector<8x96xbf16>
    %11 = vector.extract_strided_slice %10 {offsets = [0, 0], sizes = [8, 32], strides = [1, 1]} : vector<8x96xbf16> to vector<8x32xbf16>
    %12 = vector.extract_strided_slice %10 {offsets = [0, 32], sizes = [8, 64], strides = [1, 1]} : vector<8x96xbf16> to vector<8x64xbf16>
    %13 = vector.extract_strided_slice %11 {offsets = [0, 0], sizes = [8, 8], strides = [1, 1]} : vector<8x32xbf16> to vector<8x8xbf16>
    %14 = vector.extract_strided_slice %12 {offsets = [0, 0], sizes = [8, 8], strides = [1, 1]} : vector<8x64xbf16> to vector<8x8xbf16>
    %15 = vector.extract_strided_slice %12 {offsets = [0, 32], sizes = [8, 8], strides = [1, 1]} : vector<8x64xbf16> to vector<8x8xbf16>
    "tpu.trace_start"() <{level = 10 : i32, message = "qd,kd->qk"}> : () -> ()
    %cst_10 = arith.constant dense<0.000000e+00> : vector<8x8xf32>
    %16 = tpu.matmul %13, %14, %cst_10 {dimension_numbers = #tpu.dot_dimension_numbers<[1], [1], [0], [0], [0, 0, 1, 0], [], []>} : vector<8x8xbf16>, vector<8x8xbf16>, vector<8x8xf32> -> vector<8x8xf32>
    "tpu.trace_stop"() : () -> ()
    %cst_11 = arith.constant dense<0xFF800000> : vector<8xf32>
    %17 = vector.multi_reduction <maximumf>, %16, %cst_11 [1] : vector<8x8xf32> to vector<8xf32>
    %18 = vector.shape_cast %17 : vector<8xf32> to vector<8x1xf32>
    %19 = vector.broadcast %18 : vector<8x1xf32> to vector<8x8xf32>
    %20 = arith.subf %16, %19 : vector<8x8xf32>
    %21 = math.exp %20 : vector<8x8xf32>
    %cst_12 = arith.constant dense<0.000000e+00> : vector<8xf32>
    %22 = vector.multi_reduction <add>, %21, %cst_12 [1] : vector<8x8xf32> to vector<8xf32>
    %23 = vector.shape_cast %22 : vector<8xf32> to vector<8x1xf32>
    %24 = tpu.reciprocal %23 {approx = true} : vector<8x1xf32> -> vector<8x1xf32>
    %25 = vector.broadcast %24 : vector<8x1xf32> to vector<8x8xf32>
    %26 = arith.mulf %21, %25 : vector<8x8xf32>
    %c0_13 = arith.constant 0 : index
    %c0_14 = arith.constant 0 : index
    %c0_15 = arith.constant 0 : index
    %c0_16 = arith.constant 0 : index
    %27 = vector.load %arg7[%c0_13, %c0_14, %c0_15, %c0_16] : memref<2x4x8x8xf32, #tpu.memory_space<vmem>>, vector<1x1x8x8xf32>
    %28 = vector.shape_cast %27 : vector<1x1x8x8xf32> to vector<8x8xf32>
    %29 = vector.shape_cast %26 : vector<8x8xf32> to vector<1x1x8x8xf32>
    tpu.vector_store %arg7[%c0_13, %c0_14, %c0_15, %c0_16], %29 {strides = array<i32>} : memref<2x4x8x8xf32, #tpu.memory_space<vmem>>, vector<1x1x8x8xf32>,
    %30 = arith.truncf %26 : vector<8x8xf32> to vector<8x8xbf16>
    %cst_17 = arith.constant dense<0.000000e+00> : vector<8x8xf32>
    %31 = tpu.matmul %30, %15, %cst_17 {dimension_numbers = #tpu.dot_dimension_numbers<[1], [0], [0], [1], [0, 0, 1, 1], [], []>} : vector<8x8xbf16>, vector<8x8xbf16>, vector<8x8xf32> -> vector<8x8xf32>
    %c0_18 = arith.constant 0 : index
    %c0_19 = arith.constant 0 : index
    %32 = vector.load %arg8[%c0_18, %c0_19] : memref<8x32xf32, #tpu.memory_space<vmem>>, vector<8x8xf32>
    tpu.vector_store %arg8[%c0_18, %c0_19], %31 {strides = array<i32>} : memref<8x32xf32, #tpu.memory_space<vmem>>, vector<8x8xf32>,
    %33 = vector.extract_strided_slice %11 {offsets = [0, 8], sizes = [8, 8], strides = [1, 1]} : vector<8x32xbf16> to vector<8x8xbf16>
    %34 = vector.extract_strided_slice %12 {offsets = [0, 8], sizes = [8, 8], strides = [1, 1]} : vector<8x64xbf16> to vector<8x8xbf16>
    %35 = vector.extract_strided_slice %12 {offsets = [0, 40], sizes = [8, 8], strides = [1, 1]} : vector<8x64xbf16> to vector<8x8xbf16>
    "tpu.trace_start"() <{level = 10 : i32, message = "qd,kd->qk"}> : () -> ()
    %cst_20 = arith.constant dense<0.000000e+00> : vector<8x8xf32>
    %36 = tpu.matmul %33, %34, %cst_20 {dimension_numbers = #tpu.dot_dimension_numbers<[1], [1], [0], [0], [0, 0, 1, 0], [], []>} : vector<8x8xbf16>, vector<8x8xbf16>, vector<8x8xf32> -> vector<8x8xf32>
    "tpu.trace_stop"() : () -> ()
    %cst_21 = arith.constant dense<0xFF800000> : vector<8xf32>
    %37 = vector.multi_reduction <maximumf>, %36, %cst_21 [1] : vector<8x8xf32> to vector<8xf32>
    %38 = vector.shape_cast %37 : vector<8xf32> to vector<8x1xf32>
    %39 = vector.broadcast %38 : vector<8x1xf32> to vector<8x8xf32>
    %40 = arith.subf %36, %39 : vector<8x8xf32>
    %41 = math.exp %40 : vector<8x8xf32>
    %cst_22 = arith.constant dense<0.000000e+00> : vector<8xf32>
    %42 = vector.multi_reduction <add>, %41, %cst_22 [1] : vector<8x8xf32> to vector<8xf32>
    %43 = vector.shape_cast %42 : vector<8xf32> to vector<8x1xf32>
    %44 = tpu.reciprocal %43 {approx = true} : vector<8x1xf32> -> vector<8x1xf32>
    %45 = vector.broadcast %44 : vector<8x1xf32> to vector<8x8xf32>
    %46 = arith.mulf %41, %45 : vector<8x8xf32>
    %c0_23 = arith.constant 0 : index
    %c1 = arith.constant 1 : index
    %c0_24 = arith.constant 0 : index
    %c0_25 = arith.constant 0 : index
    %47 = vector.load %arg7[%c0_23, %c1, %c0_24, %c0_25] : memref<2x4x8x8xf32, #tpu.memory_space<vmem>>, vector<1x1x8x8xf32>
    %48 = vector.shape_cast %47 : vector<1x1x8x8xf32> to vector<8x8xf32>
    %49 = vector.shape_cast %46 : vector<8x8xf32> to vector<1x1x8x8xf32>
    tpu.vector_store %arg7[%c0_23, %c1, %c0_24, %c0_25], %49 {strides = array<i32>} : memref<2x4x8x8xf32, #tpu.memory_space<vmem>>, vector<1x1x8x8xf32>,
    %50 = arith.truncf %46 : vector<8x8xf32> to vector<8x8xbf16>
    %cst_26 = arith.constant dense<0.000000e+00> : vector<8x8xf32>
    %51 = tpu.matmul %50, %35, %cst_26 {dimension_numbers = #tpu.dot_dimension_numbers<[1], [0], [0], [1], [0, 0, 1, 1], [], []>} : vector<8x8xbf16>, vector<8x8xbf16>, vector<8x8xf32> -> vector<8x8xf32>
    %c0_27 = arith.constant 0 : index
    %c8 = arith.constant 8 : index
    %52 = vector.load %arg8[%c0_27, %c8] : memref<8x32xf32, #tpu.memory_space<vmem>>, vector<8x8xf32>
    tpu.vector_store %arg8[%c0_27, %c8], %51 {strides = array<i32>} : memref<8x32xf32, #tpu.memory_space<vmem>>, vector<8x8xf32>,
    %53 = vector.extract_strided_slice %11 {offsets = [0, 16], sizes = [8, 8], strides = [1, 1]} : vector<8x32xbf16> to vector<8x8xbf16>
    %54 = vector.extract_strided_slice %12 {offsets = [0, 16], sizes = [8, 8], strides = [1, 1]} : vector<8x64xbf16> to vector<8x8xbf16>
    %55 = vector.extract_strided_slice %12 {offsets = [0, 48], sizes = [8, 8], strides = [1, 1]} : vector<8x64xbf16> to vector<8x8xbf16>
    "tpu.trace_start"() <{level = 10 : i32, message = "qd,kd->qk"}> : () -> ()
    %cst_28 = arith.constant dense<0.000000e+00> : vector<8x8xf32>
    %56 = tpu.matmul %53, %54, %cst_28 {dimension_numbers = #tpu.dot_dimension_numbers<[1], [1], [0], [0], [0, 0, 1, 0], [], []>} : vector<8x8xbf16>, vector<8x8xbf16>, vector<8x8xf32> -> vector<8x8xf32>
    "tpu.trace_stop"() : () -> ()
    %cst_29 = arith.constant dense<0xFF800000> : vector<8xf32>
    %57 = vector.multi_reduction <maximumf>, %56, %cst_29 [1] : vector<8x8xf32> to vector<8xf32>
    %58 = vector.shape_cast %57 : vector<8xf32> to vector<8x1xf32>
    %59 = vector.broadcast %58 : vector<8x1xf32> to vector<8x8xf32>
    %60 = arith.subf %56, %59 : vector<8x8xf32>
    %61 = math.exp %60 : vector<8x8xf32>
    %cst_30 = arith.constant dense<0.000000e+00> : vector<8xf32>
    %62 = vector.multi_reduction <add>, %61, %cst_30 [1] : vector<8x8xf32> to vector<8xf32>
    %63 = vector.shape_cast %62 : vector<8xf32> to vector<8x1xf32>
    %64 = tpu.reciprocal %63 {approx = true} : vector<8x1xf32> -> vector<8x1xf32>
    %65 = vector.broadcast %64 : vector<8x1xf32> to vector<8x8xf32>
    %66 = arith.mulf %61, %65 : vector<8x8xf32>
    %c0_31 = arith.constant 0 : index
    %c2 = arith.constant 2 : index
    %c0_32 = arith.constant 0 : index
    %c0_33 = arith.constant 0 : index
    %67 = vector.load %arg7[%c0_31, %c2, %c0_32, %c0_33] : memref<2x4x8x8xf32, #tpu.memory_space<vmem>>, vector<1x1x8x8xf32>
    %68 = vector.shape_cast %67 : vector<1x1x8x8xf32> to vector<8x8xf32>
    %69 = vector.shape_cast %66 : vector<8x8xf32> to vector<1x1x8x8xf32>
    tpu.vector_store %arg7[%c0_31, %c2, %c0_32, %c0_33], %69 {strides = array<i32>} : memref<2x4x8x8xf32, #tpu.memory_space<vmem>>, vector<1x1x8x8xf32>,
    %70 = arith.truncf %66 : vector<8x8xf32> to vector<8x8xbf16>
    %cst_34 = arith.constant dense<0.000000e+00> : vector<8x8xf32>
    %71 = tpu.matmul %70, %55, %cst_34 {dimension_numbers = #tpu.dot_dimension_numbers<[1], [0], [0], [1], [0, 0, 1, 1], [], []>} : vector<8x8xbf16>, vector<8x8xbf16>, vector<8x8xf32> -> vector<8x8xf32>
    %c0_35 = arith.constant 0 : index
    %c16 = arith.constant 16 : index
    %72 = vector.load %arg8[%c0_35, %c16] : memref<8x32xf32, #tpu.memory_space<vmem>>, vector<8x8xf32>
    tpu.vector_store %arg8[%c0_35, %c16], %71 {strides = array<i32>} : memref<8x32xf32, #tpu.memory_space<vmem>>, vector<8x8xf32>,
    %73 = vector.extract_strided_slice %11 {offsets = [0, 24], sizes = [8, 8], strides = [1, 1]} : vector<8x32xbf16> to vector<8x8xbf16>
    %74 = vector.extract_strided_slice %12 {offsets = [0, 24], sizes = [8, 8], strides = [1, 1]} : vector<8x64xbf16> to vector<8x8xbf16>
    %75 = vector.extract_strided_slice %12 {offsets = [0, 56], sizes = [8, 8], strides = [1, 1]} : vector<8x64xbf16> to vector<8x8xbf16>
    "tpu.trace_start"() <{level = 10 : i32, message = "qd,kd->qk"}> : () -> ()
    %cst_36 = arith.constant dense<0.000000e+00> : vector<8x8xf32>
    %76 = tpu.matmul %73, %74, %cst_36 {dimension_numbers = #tpu.dot_dimension_numbers<[1], [1], [0], [0], [0, 0, 1, 0], [], []>} : vector<8x8xbf16>, vector<8x8xbf16>, vector<8x8xf32> -> vector<8x8xf32>
    "tpu.trace_stop"() : () -> ()
    %cst_37 = arith.constant dense<0xFF800000> : vector<8xf32>
    %77 = vector.multi_reduction <maximumf>, %76, %cst_37 [1] : vector<8x8xf32> to vector<8xf32>
    %78 = vector.shape_cast %77 : vector<8xf32> to vector<8x1xf32>
    %79 = vector.broadcast %78 : vector<8x1xf32> to vector<8x8xf32>
    %80 = arith.subf %76, %79 : vector<8x8xf32>
    %81 = math.exp %80 : vector<8x8xf32>
    %cst_38 = arith.constant dense<0.000000e+00> : vector<8xf32>
    %82 = vector.multi_reduction <add>, %81, %cst_38 [1] : vector<8x8xf32> to vector<8xf32>
    %83 = vector.shape_cast %82 : vector<8xf32> to vector<8x1xf32>
    %84 = tpu.reciprocal %83 {approx = true} : vector<8x1xf32> -> vector<8x1xf32>
    %85 = vector.broadcast %84 : vector<8x1xf32> to vector<8x8xf32>
    %86 = arith.mulf %81, %85 : vector<8x8xf32>
    %c0_39 = arith.constant 0 : index
    %c3 = arith.constant 3 : index
    %c0_40 = arith.constant 0 : index
    %c0_41 = arith.constant 0 : index
    %87 = vector.load %arg7[%c0_39, %c3, %c0_40, %c0_41] : memref<2x4x8x8xf32, #tpu.memory_space<vmem>>, vector<1x1x8x8xf32>
    %88 = vector.shape_cast %87 : vector<1x1x8x8xf32> to vector<8x8xf32>
    %89 = vector.shape_cast %86 : vector<8x8xf32> to vector<1x1x8x8xf32>
    tpu.vector_store %arg7[%c0_39, %c3, %c0_40, %c0_41], %89 {strides = array<i32>} : memref<2x4x8x8xf32, #tpu.memory_space<vmem>>, vector<1x1x8x8xf32>,
    %90 = arith.truncf %86 : vector<8x8xf32> to vector<8x8xbf16>
    %cst_42 = arith.constant dense<0.000000e+00> : vector<8x8xf32>
    %91 = tpu.matmul %90, %75, %cst_42 {dimension_numbers = #tpu.dot_dimension_numbers<[1], [0], [0], [1], [0, 0, 1, 1], [], []>} : vector<8x8xbf16>, vector<8x8xbf16>, vector<8x8xf32> -> vector<8x8xf32>
    %c0_43 = arith.constant 0 : index
    %c24 = arith.constant 24 : index
    %92 = vector.load %arg8[%c0_43, %c24] : memref<8x32xf32, #tpu.memory_space<vmem>>, vector<8x8xf32>
    tpu.vector_store %arg8[%c0_43, %c24], %91 {strides = array<i32>} : memref<8x32xf32, #tpu.memory_space<vmem>>, vector<8x8xf32>,
    %c0_44 = arith.constant 0 : index
    %c0_45 = arith.constant 0 : index
    %93 = vector.load %arg8[%c0_44, %c0_45] : memref<8x32xf32, #tpu.memory_space<vmem>>, vector<8x32xf32>
    %94 = arith.truncf %93 : vector<8x32xf32> to vector<8x32xbf16>
    %cst_46 = arith.constant dense<0.000000e+00> : vector<8x32xf32>
    %95 = tpu.matmul %94, %1, %cst_46 {dimension_numbers = #tpu.dot_dimension_numbers<[1], [0], [0], [1], [0, 0, 1, 1], [], []>} : vector<8x32xbf16>, vector<32x32xbf16>, vector<8x32xf32> -> vector<8x32xf32>
    %96 = vector.broadcast %3 : vector<1x32xf32> to vector<8x32xf32>
    %97 = arith.addf %95, %96 : vector<8x32xf32>
    %c0_47 = arith.constant 0 : index
    %c0_48 = arith.constant 0 : index
    %c0_49 = arith.constant 0 : index
    %98 = vector.load %arg6[%c0_47, %c0_48, %c0_49] : memref<2x8x32xf32, #tpu.memory_space<vmem>>, vector<1x8x32xf32>
    %99 = vector.shape_cast %98 : vector<1x8x32xf32> to vector<8x32xf32>
    %100 = vector.shape_cast %97 : vector<8x32xf32> to vector<1x8x32xf32>
    tpu.vector_store %arg6[%c0_47, %c0_48, %c0_49], %100 {strides = array<i32>} : memref<2x8x32xf32, #tpu.memory_space<vmem>>, vector<1x8x32xf32>,
    %c1_50 = arith.constant 1 : index
    %c0_51 = arith.constant 0 : index
    %c0_52 = arith.constant 0 : index
    %101 = vector.load %arg1[%c1_50, %c0_51, %c0_52] : memref<2x8x32xf32, #tpu.memory_space<vmem>>, vector<1x8x32xf32>
    %102 = vector.shape_cast %101 : vector<1x8x32xf32> to vector<8x32xf32>
    %103 = arith.truncf %102 : vector<8x32xf32> to vector<8x32xbf16>
    %cst_53 = arith.constant dense<0.000000e+00> : vector<8x96xf32>
    %104 = tpu.matmul %103, %0, %cst_53 {dimension_numbers = #tpu.dot_dimension_numbers<[1], [0], [0], [1], [0, 0, 1, 1], [], []>} : vector<8x32xbf16>, vector<32x96xbf16>, vector<8x96xf32> -> vector<8x96xf32>
    %105 = vector.broadcast %2 : vector<1x96xf32> to vector<8x96xf32>
    %106 = arith.addf %104, %105 : vector<8x96xf32>
    %107 = arith.truncf %106 : vector<8x96xf32> to vector<8x96xbf16>
    %108 = vector.extract_strided_slice %107 {offsets = [0, 0], sizes = [8, 32], strides = [1, 1]} : vector<8x96xbf16> to vector<8x32xbf16>
    %109 = vector.extract_strided_slice %107 {offsets = [0, 32], sizes = [8, 64], strides = [1, 1]} : vector<8x96xbf16> to vector<8x64xbf16>
    %110 = vector.extract_strided_slice %108 {offsets = [0, 0], sizes = [8, 8], strides = [1, 1]} : vector<8x32xbf16> to vector<8x8xbf16>
    %111 = vector.extract_strided_slice %109 {offsets = [0, 0], sizes = [8, 8], strides = [1, 1]} : vector<8x64xbf16> to vector<8x8xbf16>
    %112 = vector.extract_strided_slice %109 {offsets = [0, 32], sizes = [8, 8], strides = [1, 1]} : vector<8x64xbf16> to vector<8x8xbf16>
    "tpu.trace_start"() <{level = 10 : i32, message = "qd,kd->qk"}> : () -> ()
    %cst_54 = arith.constant dense<0.000000e+00> : vector<8x8xf32>
    %113 = tpu.matmul %110, %111, %cst_54 {dimension_numbers = #tpu.dot_dimension_numbers<[1], [1], [0], [0], [0, 0, 1, 0], [], []>} : vector<8x8xbf16>, vector<8x8xbf16>, vector<8x8xf32> -> vector<8x8xf32>
    "tpu.trace_stop"() : () -> ()
    %cst_55 = arith.constant dense<0xFF800000> : vector<8xf32>
    %114 = vector.multi_reduction <maximumf>, %113, %cst_55 [1] : vector<8x8xf32> to vector<8xf32>
    %115 = vector.shape_cast %114 : vector<8xf32> to vector<8x1xf32>
    %116 = vector.broadcast %115 : vector<8x1xf32> to vector<8x8xf32>
    %117 = arith.subf %113, %116 : vector<8x8xf32>
    %118 = math.exp %117 : vector<8x8xf32>
    %cst_56 = arith.constant dense<0.000000e+00> : vector<8xf32>
    %119 = vector.multi_reduction <add>, %118, %cst_56 [1] : vector<8x8xf32> to vector<8xf32>
    %120 = vector.shape_cast %119 : vector<8xf32> to vector<8x1xf32>
    %121 = tpu.reciprocal %120 {approx = true} : vector<8x1xf32> -> vector<8x1xf32>
    %122 = vector.broadcast %121 : vector<8x1xf32> to vector<8x8xf32>
    %123 = arith.mulf %118, %122 : vector<8x8xf32>
    %c1_57 = arith.constant 1 : index
    %c0_58 = arith.constant 0 : index
    %c0_59 = arith.constant 0 : index
    %c0_60 = arith.constant 0 : index
    %124 = vector.load %arg7[%c1_57, %c0_58, %c0_59, %c0_60] : memref<2x4x8x8xf32, #tpu.memory_space<vmem>>, vector<1x1x8x8xf32>
    %125 = vector.shape_cast %124 : vector<1x1x8x8xf32> to vector<8x8xf32>
    %126 = vector.shape_cast %123 : vector<8x8xf32> to vector<1x1x8x8xf32>
    tpu.vector_store %arg7[%c1_57, %c0_58, %c0_59, %c0_60], %126 {strides = array<i32>} : memref<2x4x8x8xf32, #tpu.memory_space<vmem>>, vector<1x1x8x8xf32>,
    %127 = arith.truncf %123 : vector<8x8xf32> to vector<8x8xbf16>
    %cst_61 = arith.constant dense<0.000000e+00> : vector<8x8xf32>
    %128 = tpu.matmul %127, %112, %cst_61 {dimension_numbers = #tpu.dot_dimension_numbers<[1], [0], [0], [1], [0, 0, 1, 1], [], []>} : vector<8x8xbf16>, vector<8x8xbf16>, vector<8x8xf32> -> vector<8x8xf32>
    %c0_62 = arith.constant 0 : index
    %c0_63 = arith.constant 0 : index
    %129 = vector.load %arg8[%c0_62, %c0_63] : memref<8x32xf32, #tpu.memory_space<vmem>>, vector<8x8xf32>
    tpu.vector_store %arg8[%c0_62, %c0_63], %128 {strides = array<i32>} : memref<8x32xf32, #tpu.memory_space<vmem>>, vector<8x8xf32>,
    %130 = vector.extract_strided_slice %108 {offsets = [0, 8], sizes = [8, 8], strides = [1, 1]} : vector<8x32xbf16> to vector<8x8xbf16>
    %131 = vector.extract_strided_slice %109 {offsets = [0, 8], sizes = [8, 8], strides = [1, 1]} : vector<8x64xbf16> to vector<8x8xbf16>
    %132 = vector.extract_strided_slice %109 {offsets = [0, 40], sizes = [8, 8], strides = [1, 1]} : vector<8x64xbf16> to vector<8x8xbf16>
    "tpu.trace_start"() <{level = 10 : i32, message = "qd,kd->qk"}> : () -> ()
    %cst_64 = arith.constant dense<0.000000e+00> : vector<8x8xf32>
    %133 = tpu.matmul %130, %131, %cst_64 {dimension_numbers = #tpu.dot_dimension_numbers<[1], [1], [0], [0], [0, 0, 1, 0], [], []>} : vector<8x8xbf16>, vector<8x8xbf16>, vector<8x8xf32> -> vector<8x8xf32>
    "tpu.trace_stop"() : () -> ()
    %cst_65 = arith.constant dense<0xFF800000> : vector<8xf32>
    %134 = vector.multi_reduction <maximumf>, %133, %cst_65 [1] : vector<8x8xf32> to vector<8xf32>
    %135 = vector.shape_cast %134 : vector<8xf32> to vector<8x1xf32>
    %136 = vector.broadcast %135 : vector<8x1xf32> to vector<8x8xf32>
    %137 = arith.subf %133, %136 : vector<8x8xf32>
    %138 = math.exp %137 : vector<8x8xf32>
    %cst_66 = arith.constant dense<0.000000e+00> : vector<8xf32>
    %139 = vector.multi_reduction <add>, %138, %cst_66 [1] : vector<8x8xf32> to vector<8xf32>
    %140 = vector.shape_cast %139 : vector<8xf32> to vector<8x1xf32>
    %141 = tpu.reciprocal %140 {approx = true} : vector<8x1xf32> -> vector<8x1xf32>
    %142 = vector.broadcast %141 : vector<8x1xf32> to vector<8x8xf32>
    %143 = arith.mulf %138, %142 : vector<8x8xf32>
    %c1_67 = arith.constant 1 : index
    %c1_68 = arith.constant 1 : index
    %c0_69 = arith.constant 0 : index
    %c0_70 = arith.constant 0 : index
    %144 = vector.load %arg7[%c1_67, %c1_68, %c0_69, %c0_70] : memref<2x4x8x8xf32, #tpu.memory_space<vmem>>, vector<1x1x8x8xf32>
    %145 = vector.shape_cast %144 : vector<1x1x8x8xf32> to vector<8x8xf32>
    %146 = vector.shape_cast %143 : vector<8x8xf32> to vector<1x1x8x8xf32>
    tpu.vector_store %arg7[%c1_67, %c1_68, %c0_69, %c0_70], %146 {strides = array<i32>} : memref<2x4x8x8xf32, #tpu.memory_space<vmem>>, vector<1x1x8x8xf32>,
    %147 = arith.truncf %143 : vector<8x8xf32> to vector<8x8xbf16>
    %cst_71 = arith.constant dense<0.000000e+00> : vector<8x8xf32>
    %148 = tpu.matmul %147, %132, %cst_71 {dimension_numbers = #tpu.dot_dimension_numbers<[1], [0], [0], [1], [0, 0, 1, 1], [], []>} : vector<8x8xbf16>, vector<8x8xbf16>, vector<8x8xf32> -> vector<8x8xf32>
    %c0_72 = arith.constant 0 : index
    %c8_73 = arith.constant 8 : index
    %149 = vector.load %arg8[%c0_72, %c8_73] : memref<8x32xf32, #tpu.memory_space<vmem>>, vector<8x8xf32>
    tpu.vector_store %arg8[%c0_72, %c8_73], %148 {strides = array<i32>} : memref<8x32xf32, #tpu.memory_space<vmem>>, vector<8x8xf32>,
    %150 = vector.extract_strided_slice %108 {offsets = [0, 16], sizes = [8, 8], strides = [1, 1]} : vector<8x32xbf16> to vector<8x8xbf16>
    %151 = vector.extract_strided_slice %109 {offsets = [0, 16], sizes = [8, 8], strides = [1, 1]} : vector<8x64xbf16> to vector<8x8xbf16>
    %152 = vector.extract_strided_slice %109 {offsets = [0, 48], sizes = [8, 8], strides = [1, 1]} : vector<8x64xbf16> to vector<8x8xbf16>
    "tpu.trace_start"() <{level = 10 : i32, message = "qd,kd->qk"}> : () -> ()
    %cst_74 = arith.constant dense<0.000000e+00> : vector<8x8xf32>
    %153 = tpu.matmul %150, %151, %cst_74 {dimension_numbers = #tpu.dot_dimension_numbers<[1], [1], [0], [0], [0, 0, 1, 0], [], []>} : vector<8x8xbf16>, vector<8x8xbf16>, vector<8x8xf32> -> vector<8x8xf32>
    "tpu.trace_stop"() : () -> ()
    %cst_75 = arith.constant dense<0xFF800000> : vector<8xf32>
    %154 = vector.multi_reduction <maximumf>, %153, %cst_75 [1] : vector<8x8xf32> to vector<8xf32>
    %155 = vector.shape_cast %154 : vector<8xf32> to vector<8x1xf32>
    %156 = vector.broadcast %155 : vector<8x1xf32> to vector<8x8xf32>
    %157 = arith.subf %153, %156 : vector<8x8xf32>
    %158 = math.exp %157 : vector<8x8xf32>
    %cst_76 = arith.constant dense<0.000000e+00> : vector<8xf32>
    %159 = vector.multi_reduction <add>, %158, %cst_76 [1] : vector<8x8xf32> to vector<8xf32>
    %160 = vector.shape_cast %159 : vector<8xf32> to vector<8x1xf32>
    %161 = tpu.reciprocal %160 {approx = true} : vector<8x1xf32> -> vector<8x1xf32>
    %162 = vector.broadcast %161 : vector<8x1xf32> to vector<8x8xf32>
    %163 = arith.mulf %158, %162 : vector<8x8xf32>
    %c1_77 = arith.constant 1 : index
    %c2_78 = arith.constant 2 : index
    %c0_79 = arith.constant 0 : index
    %c0_80 = arith.constant 0 : index
    %164 = vector.load %arg7[%c1_77, %c2_78, %c0_79, %c0_80] : memref<2x4x8x8xf32, #tpu.memory_space<vmem>>, vector<1x1x8x8xf32>
    %165 = vector.shape_cast %164 : vector<1x1x8x8xf32> to vector<8x8xf32>
    %166 = vector.shape_cast %163 : vector<8x8xf32> to vector<1x1x8x8xf32>
    tpu.vector_store %arg7[%c1_77, %c2_78, %c0_79, %c0_80], %166 {strides = array<i32>} : memref<2x4x8x8xf32, #tpu.memory_space<vmem>>, vector<1x1x8x8xf32>,
    %167 = arith.truncf %163 : vector<8x8xf32> to vector<8x8xbf16>
    %cst_81 = arith.constant dense<0.000000e+00> : vector<8x8xf32>
    %168 = tpu.matmul %167, %152, %cst_81 {dimension_numbers = #tpu.dot_dimension_numbers<[1], [0], [0], [1], [0, 0, 1, 1], [], []>} : vector<8x8xbf16>, vector<8x8xbf16>, vector<8x8xf32> -> vector<8x8xf32>
    %c0_82 = arith.constant 0 : index
    %c16_83 = arith.constant 16 : index
    %169 = vector.load %arg8[%c0_82, %c16_83] : memref<8x32xf32, #tpu.memory_space<vmem>>, vector<8x8xf32>
    tpu.vector_store %arg8[%c0_82, %c16_83], %168 {strides = array<i32>} : memref<8x32xf32, #tpu.memory_space<vmem>>, vector<8x8xf32>,
    %170 = vector.extract_strided_slice %108 {offsets = [0, 24], sizes = [8, 8], strides = [1, 1]} : vector<8x32xbf16> to vector<8x8xbf16>
    %171 = vector.extract_strided_slice %109 {offsets = [0, 24], sizes = [8, 8], strides = [1, 1]} : vector<8x64xbf16> to vector<8x8xbf16>
    %172 = vector.extract_strided_slice %109 {offsets = [0, 56], sizes = [8, 8], strides = [1, 1]} : vector<8x64xbf16> to vector<8x8xbf16>
    "tpu.trace_start"() <{level = 10 : i32, message = "qd,kd->qk"}> : () -> ()
    %cst_84 = arith.constant dense<0.000000e+00> : vector<8x8xf32>
    %173 = tpu.matmul %170, %171, %cst_84 {dimension_numbers = #tpu.dot_dimension_numbers<[1], [1], [0], [0], [0, 0, 1, 0], [], []>} : vector<8x8xbf16>, vector<8x8xbf16>, vector<8x8xf32> -> vector<8x8xf32>
    "tpu.trace_stop"() : () -> ()
    %cst_85 = arith.constant dense<0xFF800000> : vector<8xf32>
    %174 = vector.multi_reduction <maximumf>, %173, %cst_85 [1] : vector<8x8xf32> to vector<8xf32>
    %175 = vector.shape_cast %174 : vector<8xf32> to vector<8x1xf32>
    %176 = vector.broadcast %175 : vector<8x1xf32> to vector<8x8xf32>
    %177 = arith.subf %173, %176 : vector<8x8xf32>
    %178 = math.exp %177 : vector<8x8xf32>
    %cst_86 = arith.constant dense<0.000000e+00> : vector<8xf32>
    %179 = vector.multi_reduction <add>, %178, %cst_86 [1] : vector<8x8xf32> to vector<8xf32>
    %180 = vector.shape_cast %179 : vector<8xf32> to vector<8x1xf32>
    %181 = tpu.reciprocal %180 {approx = true} : vector<8x1xf32> -> vector<8x1xf32>
    %182 = vector.broadcast %181 : vector<8x1xf32> to vector<8x8xf32>
    %183 = arith.mulf %178, %182 : vector<8x8xf32>
    %c1_87 = arith.constant 1 : index
    %c3_88 = arith.constant 3 : index
    %c0_89 = arith.constant 0 : index
    %c0_90 = arith.constant 0 : index
    %184 = vector.load %arg7[%c1_87, %c3_88, %c0_89, %c0_90] : memref<2x4x8x8xf32, #tpu.memory_space<vmem>>, vector<1x1x8x8xf32>
    %185 = vector.shape_cast %184 : vector<1x1x8x8xf32> to vector<8x8xf32>
    %186 = vector.shape_cast %183 : vector<8x8xf32> to vector<1x1x8x8xf32>
    tpu.vector_store %arg7[%c1_87, %c3_88, %c0_89, %c0_90], %186 {strides = array<i32>} : memref<2x4x8x8xf32, #tpu.memory_space<vmem>>, vector<1x1x8x8xf32>,
    %187 = arith.truncf %183 : vector<8x8xf32> to vector<8x8xbf16>
    %cst_91 = arith.constant dense<0.000000e+00> : vector<8x8xf32>
    %188 = tpu.matmul %187, %172, %cst_91 {dimension_numbers = #tpu.dot_dimension_numbers<[1], [0], [0], [1], [0, 0, 1, 1], [], []>} : vector<8x8xbf16>, vector<8x8xbf16>, vector<8x8xf32> -> vector<8x8xf32>
    %c0_92 = arith.constant 0 : index
    %c24_93 = arith.constant 24 : index
    %189 = vector.load %arg8[%c0_92, %c24_93] : memref<8x32xf32, #tpu.memory_space<vmem>>, vector<8x8xf32>
    tpu.vector_store %arg8[%c0_92, %c24_93], %188 {strides = array<i32>} : memref<8x32xf32, #tpu.memory_space<vmem>>, vector<8x8xf32>,
    %c0_94 = arith.constant 0 : index
    %c0_95 = arith.constant 0 : index
    %190 = vector.load %arg8[%c0_94, %c0_95] : memref<8x32xf32, #tpu.memory_space<vmem>>, vector<8x32xf32>
    %191 = arith.truncf %190 : vector<8x32xf32> to vector<8x32xbf16>
    %cst_96 = arith.constant dense<0.000000e+00> : vector<8x32xf32>
    %192 = tpu.matmul %191, %1, %cst_96 {dimension_numbers = #tpu.dot_dimension_numbers<[1], [0], [0], [1], [0, 0, 1, 1], [], []>} : vector<8x32xbf16>, vector<32x32xbf16>, vector<8x32xf32> -> vector<8x32xf32>
    %193 = vector.broadcast %3 : vector<1x32xf32> to vector<8x32xf32>
    %194 = arith.addf %192, %193 : vector<8x32xf32>
    %c1_97 = arith.constant 1 : index
    %c0_98 = arith.constant 0 : index
    %c0_99 = arith.constant 0 : index
    %195 = vector.load %arg6[%c1_97, %c0_98, %c0_99] : memref<2x8x32xf32, #tpu.memory_space<vmem>>, vector<1x8x32xf32>
    %196 = vector.shape_cast %195 : vector<1x8x32xf32> to vector<8x32xf32>
    %197 = vector.shape_cast %194 : vector<8x32xf32> to vector<1x8x32xf32>
    tpu.vector_store %arg6[%c1_97, %c0_98, %c0_99], %197 {strides = array<i32>} : memref<2x8x32xf32, #tpu.memory_space<vmem>>, vector<1x8x32xf32>,
    return
  }
  func.func @transform_0(%arg0: i32) -> (i32, i32, i32) {
    %c0_i32 = arith.constant 0 : i32
    %c0_i32_0 = arith.constant 0 : i32
    %c0_i32_1 = arith.constant 0 : i32
    return %arg0, %c0_i32, %c0_i32_0 : i32, i32, i32
  }
  func.func @transform_1(%arg0: i32) -> (i32, i32) {
    %c0_i32 = arith.constant 0 : i32
    %c0_i32_0 = arith.constant 0 : i32
    %c0_i32_1 = arith.constant 0 : i32
    return %c0_i32, %c0_i32_0 : i32, i32
  }
  func.func @transform_2(%arg0: i32) -> (i32, i32) {
    %c0_i32 = arith.constant 0 : i32
    %c0_i32_0 = arith.constant 0 : i32
    %c0_i32_1 = arith.constant 0 : i32
    return %c0_i32, %c0_i32_0 : i32, i32
  }
  func.func @transform_3(%arg0: i32) -> (i32, i32) {
    %c0_i32 = arith.constant 0 : i32
    %c0_i32_0 = arith.constant 0 : i32
    %c0_i32_1 = arith.constant 0 : i32
    return %c0_i32, %c0_i32_0 : i32, i32
  }
  func.func @transform_4(%arg0: i32) -> (i32, i32) {
    %c0_i32 = arith.constant 0 : i32
    %c0_i32_0 = arith.constant 0 : i32
    %c0_i32_1 = arith.constant 0 : i32
    return %c0_i32, %c0_i32_0 : i32, i32
  }
  func.func @transform_5(%arg0: i32) -> (i32, i32, i32) {
    %c0_i32 = arith.constant 0 : i32
    %c0_i32_0 = arith.constant 0 : i32
    %c0_i32_1 = arith.constant 0 : i32
    return %arg0, %c0_i32, %c0_i32_0 : i32, i32, i32
  }
  func.func @transform_6(%arg0: i32) -> (i32, i32, i32, i32) {
    %c0_i32 = arith.constant 0 : i32
    %c0_i32_0 = arith.constant 0 : i32
    %c0_i32_1 = arith.constant 0 : i32
    %c0_i32_2 = arith.constant 0 : i32
    return %arg0, %c0_i32, %c0_i32_0, %c0_i32_1 : i32, i32, i32, i32
  }
}

module attributes {stable_mosaic.version = 11 : i64} {
  func.func @kernel(%arg0: i32, %arg1: memref<2x8x32xf32, #tpu.memory_space<vmem>>, %arg2: memref<32x96xbf16, #tpu.memory_space<vmem>>, %arg3: memref<1x96xf32, #tpu.memory_space<vmem>>, %arg4: memref<32x32xbf16, #tpu.memory_space<vmem>>, %arg5: memref<1x32xf32, #tpu.memory_space<vmem>>, %arg6: memref<2x8x32xf32, #tpu.memory_space<vmem>>, %arg7: memref<2x4x8x8xf32, #tpu.memory_space<vmem>>, %arg8: memref<8x32xf32, #tpu.memory_space<vmem>>) attributes {dimension_semantics = [#tpu.dimension_semantics<parallel>], iteration_bounds = array<i64: 1>, scalar_prefetch = 0 : i64, scratch_operands = 1 : i64, tpu.core_type = #tpu.core_type<tc>, window_params = [{transform_indices = @transform_0, window_bounds = array<i64: 2, 8, 32>}, {pipeline_mode = #tpu.pipeline_mode<synchronous>, transform_indices = @transform_1, window_bounds = array<i64: 32, 96>}, {pipeline_mode = #tpu.pipeline_mode<synchronous>, transform_indices = @transform_2, window_bounds = array<i64: 1, 96>}, {pipeline_mode = #tpu.pipeline_mode<synchronous>, transform_indices = @transform_3, window_bounds = array<i64: 32, 32>}, {pipeline_mode = #tpu.pipeline_mode<synchronous>, transform_indices = @transform_4, window_bounds = array<i64: 1, 32>}, {transform_indices = @transform_5, window_bounds = array<i64: 2, 8, 32>}, {transform_indices = @transform_6, window_bounds = array<i64: 2, 4, 8, 8>}]} {
    %c0 = arith.constant 0 : index
    %c0_0 = arith.constant 0 : index
    %0 = vector.load %arg2[%c0, %c0_0] : memref<32x96xbf16, #tpu.memory_space<vmem>>, vector<32x96xbf16>
    %c0_1 = arith.constant 0 : index
    %c0_2 = arith.constant 0 : index
    %1 = vector.load %arg4[%c0_1, %c0_2] : memref<32x32xbf16, #tpu.memory_space<vmem>>, vector<32x32xbf16>
    %c0_3 = arith.constant 0 : index
    %c0_4 = arith.constant 0 : index
    %2 = vector.load %arg3[%c0_3, %c0_4] : memref<1x96xf32, #tpu.memory_space<vmem>>, vector<1x96xf32>
    %c0_5 = arith.constant 0 : index
    %c0_6 = arith.constant 0 : index
    %3 = vector.load %arg5[%c0_5, %c0_6] : memref<1x32xf32, #tpu.memory_space<vmem>>, vector<1x32xf32>
    %c0_7 = arith.constant 0 : index
    %c0_8 = arith.constant 0 : index
    %c0_9 = arith.constant 0 : index
    %4 = vector.load %arg1[%c0_7, %c0_8, %c0_9] : memref<2x8x32xf32, #tpu.memory_space<vmem>>, vector<1x8x32xf32>
    %5 = vector.shape_cast %4 : vector<1x8x32xf32> to vector<8x32xf32>
    %6 = arith.truncf %5 : vector<8x32xf32> to vector<8x32xbf16>
    %cst = arith.constant dense<0.000000e+00> : vector<8x96xf32>
    %7 = tpu.matmul %6, %0, %cst {dimension_numbers = #tpu.dot_dimension_numbers<[1], [0], [0], [1], [0, 0, 1, 1], [], []>} : vector<8x32xbf16>, vector<32x96xbf16>, vector<8x96xf32> -> vector<8x96xf32>
    %8 = vector.broadcast %2 : vector<1x96xf32> to vector<8x96xf32>
    %9 = arith.addf %7, %8 : vector<8x96xf32>
    %10 = arith.truncf %9 : vector<8x96xf32> to vector<8x96xbf16>
    %11 = vector.extract_strided_slice %10 {offsets = [0, 0], sizes = [8, 32], strides = [1, 1]} : vector<8x96xbf16> to vector<8x32xbf16>
    %12 = vector.extract_strided_slice %10 {offsets = [0, 32], sizes = [8, 64], strides = [1, 1]} : vector<8x96xbf16> to vector<8x64xbf16>
    %13 = vector.extract_strided_slice %11 {offsets = [0, 0], sizes = [8, 8], strides = [1, 1]} : vector<8x32xbf16> to vector<8x8xbf16>
    %14 = vector.extract_strided_slice %12 {offsets = [0, 0], sizes = [8, 8], strides = [1, 1]} : vector<8x64xbf16> to vector<8x8xbf16>
    %15 = vector.extract_strided_slice %12 {offsets = [0, 32], sizes = [8, 8], strides = [1, 1]} : vector<8x64xbf16> to vector<8x8xbf16>
    "tpu.trace_start"() <{level = 10 : i32, message = "qd,kd->qk"}> : () -> ()
    %cst_10 = arith.constant dense<0.000000e+00> : vector<8x8xf32>
    %16 = tpu.matmul %13, %14, %cst_10 {dimension_numbers = #tpu.dot_dimension_numbers<[1], [1], [0], [0], [0, 0, 1, 0], [], []>} : vector<8x8xbf16>, vector<8x8xbf16>, vector<8x8xf32> -> vector<8x8xf32>
    "tpu.trace_stop"() : () -> ()
    %cst_11 = arith.constant dense<0xFF800000> : vector<8xf32>
    %17 = vector.multi_reduction <maximumf>, %16, %cst_11 [1] : vector<8x8xf32> to vector<8xf32>
    %18 = vector.shape_cast %17 : vector<8xf32> to vector<8x1xf32>
    %19 = vector.broadcast %18 : vector<8x1xf32> to vector<8x8xf32>
    %20 = arith.subf %16, %19 : vector<8x8xf32>
    %21 = math.exp %20 : vector<8x8xf32>
    %cst_12 = arith.constant dense<0.000000e+00> : vector<8xf32>
    %22 = vector.multi_reduction <add>, %21, %cst_12 [1] : vector<8x8xf32> to vector<8xf32>
    %23 = vector.shape_cast %22 : vector<8xf32> to vector<8x1xf32>
    %24 = tpu.reciprocal %23 {approx = true} : vector<8x1xf32> -> vector<8x1xf32>
    %25 = vector.broadcast %24 : vector<8x1xf32> to vector<8x8xf32>
    %26 = arith.mulf %21, %25 : vector<8x8xf32>
    %c0_13 = arith.constant 0 : index
    %c0_14 = arith.constant 0 : index
    %c0_15 = arith.constant 0 : index
    %c0_16 = arith.constant 0 : index
    %27 = vector.load %arg7[%c0_13, %c0_14, %c0_15, %c0_16] : memref<2x4x8x8xf32, #tpu.memory_space<vmem>>, vector<1x1x8x8xf32>
    %28 = vector.shape_cast %27 : vector<1x1x8x8xf32> to vector<8x8xf32>
    %29 = vector.shape_cast %26 : vector<8x8xf32> to vector<1x1x8x8xf32>
    tpu.vector_store %arg7[%c0_13, %c0_14, %c0_15, %c0_16], %29 {strides = array<i32>} : memref<2x4x8x8xf32, #tpu.memory_space<vmem>>, vector<1x1x8x8xf32>,
    %30 = arith.truncf %26 : vector<8x8xf32> to vector<8x8xbf16>
    %cst_17 = arith.constant dense<0.000000e+00> : vector<8x8xf32>
    %31 = tpu.matmul %30, %15, %cst_17 {dimension_numbers = #tpu.dot_dimension_numbers<[1], [0], [0], [1], [0, 0, 1, 1], [], []>} : vector<8x8xbf16>, vector<8x8xbf16>, vector<8x8xf32> -> vector<8x8xf32>
    %c0_18 = arith.constant 0 : index
    %c0_19 = arith.constant 0 : index
    %32 = vector.load %arg8[%c0_18, %c0_19] : memref<8x32xf32, #tpu.memory_space<vmem>>, vector<8x8xf32>
    tpu.vector_store %arg8[%c0_18, %c0_19], %31 {strides = array<i32>} : memref<8x32xf32, #tpu.memory_space<vmem>>, vector<8x8xf32>,
    %33 = vector.extract_strided_slice %11 {offsets = [0, 8], sizes = [8, 8], strides = [1, 1]} : vector<8x32xbf16> to vector<8x8xbf16>
    %34 = vector.extract_strided_slice %12 {offsets = [0, 8], sizes = [8, 8], strides = [1, 1]} : vector<8x64xbf16> to vector<8x8xbf16>
    %35 = vector.extract_strided_slice %12 {offsets = [0, 40], sizes = [8, 8], strides = [1, 1]} : vector<8x64xbf16> to vector<8x8xbf16>
    "tpu.trace_start"() <{level = 10 : i32, message = "qd,kd->qk"}> : () -> ()
    %cst_20 = arith.constant dense<0.000000e+00> : vector<8x8xf32>
    %36 = tpu.matmul %33, %34, %cst_20 {dimension_numbers = #tpu.dot_dimension_numbers<[1], [1], [0], [0], [0, 0, 1, 0], [], []>} : vector<8x8xbf16>, vector<8x8xbf16>, vector<8x8xf32> -> vector<8x8xf32>
    "tpu.trace_stop"() : () -> ()
    %cst_21 = arith.constant dense<0xFF800000> : vector<8xf32>
    %37 = vector.multi_reduction <maximumf>, %36, %cst_21 [1] : vector<8x8xf32> to vector<8xf32>
    %38 = vector.shape_cast %37 : vector<8xf32> to vector<8x1xf32>
    %39 = vector.broadcast %38 : vector<8x1xf32> to vector<8x8xf32>
    %40 = arith.subf %36, %39 : vector<8x8xf32>
    %41 = math.exp %40 : vector<8x8xf32>
    %cst_22 = arith.constant dense<0.000000e+00> : vector<8xf32>
    %42 = vector.multi_reduction <add>, %41, %cst_22 [1] : vector<8x8xf32> to vector<8xf32>
    %43 = vector.shape_cast %42 : vector<8xf32> to vector<8x1xf32>
    %44 = tpu.reciprocal %43 {approx = true} : vector<8x1xf32> -> vector<8x1xf32>
    %45 = vector.broadcast %44 : vector<8x1xf32> to vector<8x8xf32>
    %46 = arith.mulf %41, %45 : vector<8x8xf32>
    %c0_23 = arith.constant 0 : index
    %c1 = arith.constant 1 : index
    %c0_24 = arith.constant 0 : index
    %c0_25 = arith.constant 0 : index
    %47 = vector.load %arg7[%c0_23, %c1, %c0_24, %c0_25] : memref<2x4x8x8xf32, #tpu.memory_space<vmem>>, vector<1x1x8x8xf32>
    %48 = vector.shape_cast %47 : vector<1x1x8x8xf32> to vector<8x8xf32>
    %49 = vector.shape_cast %46 : vector<8x8xf32> to vector<1x1x8x8xf32>
    tpu.vector_store %arg7[%c0_23, %c1, %c0_24, %c0_25], %49 {strides = array<i32>} : memref<2x4x8x8xf32, #tpu.memory_space<vmem>>, vector<1x1x8x8xf32>,
    %50 = arith.truncf %46 : vector<8x8xf32> to vector<8x8xbf16>
    %cst_26 = arith.constant dense<0.000000e+00> : vector<8x8xf32>
    %51 = tpu.matmul %50, %35, %cst_26 {dimension_numbers = #tpu.dot_dimension_numbers<[1], [0], [0], [1], [0, 0, 1, 1], [], []>} : vector<8x8xbf16>, vector<8x8xbf16>, vector<8x8xf32> -> vector<8x8xf32>
    %c0_27 = arith.constant 0 : index
    %c8 = arith.constant 8 : index
    %52 = vector.load %arg8[%c0_27, %c8] : memref<8x32xf32, #tpu.memory_space<vmem>>, vector<8x8xf32>
    tpu.vector_store %arg8[%c0_27, %c8], %51 {strides = array<i32>} : memref<8x32xf32, #tpu.memory_space<vmem>>, vector<8x8xf32>,
    %53 = vector.extract_strided_slice %11 {offsets = [0, 16], sizes = [8, 8], strides = [1, 1]} : vector<8x32xbf16> to vector<8x8xbf16>
    %54 = vector.extract_strided_slice %12 {offsets = [0, 16], sizes = [8, 8], strides = [1, 1]} : vector<8x64xbf16> to vector<8x8xbf16>
    %55 = vector.extract_strided_slice %12 {offsets = [0, 48], sizes = [8, 8], strides = [1, 1]} : vector<8x64xbf16> to vector<8x8xbf16>
    "tpu.trace_start"() <{level = 10 : i32, message = "qd,kd->qk"}> : () -> ()
    %cst_28 = arith.constant dense<0.000000e+00> : vector<8x8xf32>
    %56 = tpu.matmul %53, %54, %cst_28 {dimension_numbers = #tpu.dot_dimension_numbers<[1], [1], [0], [0], [0, 0, 1, 0], [], []>} : vector<8x8xbf16>, vector<8x8xbf16>, vector<8x8xf32> -> vector<8x8xf32>
    "tpu.trace_stop"() : () -> ()
    %cst_29 = arith.constant dense<0xFF800000> : vector<8xf32>
    %57 = vector.multi_reduction <maximumf>, %56, %cst_29 [1] : vector<8x8xf32> to vector<8xf32>
    %58 = vector.shape_cast %57 : vector<8xf32> to vector<8x1xf32>
    %59 = vector.broadcast %58 : vector<8x1xf32> to vector<8x8xf32>
    %60 = arith.subf %56, %59 : vector<8x8xf32>
    %61 = math.exp %60 : vector<8x8xf32>
    %cst_30 = arith.constant dense<0.000000e+00> : vector<8xf32>
    %62 = vector.multi_reduction <add>, %61, %cst_30 [1] : vector<8x8xf32> to vector<8xf32>
    %63 = vector.shape_cast %62 : vector<8xf32> to vector<8x1xf32>
    %64 = tpu.reciprocal %63 {approx = true} : vector<8x1xf32> -> vector<8x1xf32>
    %65 = vector.broadcast %64 : vector<8x1xf32> to vector<8x8xf32>
    %66 = arith.mulf %61, %65 : vector<8x8xf32>
    %c0_31 = arith.constant 0 : index
    %c2 = arith.constant 2 : index
    %c0_32 = arith.constant 0 : index
    %c0_33 = arith.constant 0 : index
    %67 = vector.load %arg7[%c0_31, %c2, %c0_32, %c0_33] : memref<2x4x8x8xf32, #tpu.memory_space<vmem>>, vector<1x1x8x8xf32>
    %68 = vector.shape_cast %67 : vector<1x1x8x8xf32> to vector<8x8xf32>
    %69 = vector.shape_cast %66 : vector<8x8xf32> to vector<1x1x8x8xf32>
    tpu.vector_store %arg7[%c0_31, %c2, %c0_32, %c0_33], %69 {strides = array<i32>} : memref<2x4x8x8xf32, #tpu.memory_space<vmem>>, vector<1x1x8x8xf32>,
    %70 = arith.truncf %66 : vector<8x8xf32> to vector<8x8xbf16>
    %cst_34 = arith.constant dense<0.000000e+00> : vector<8x8xf32>
    %71 = tpu.matmul %70, %55, %cst_34 {dimension_numbers = #tpu.dot_dimension_numbers<[1], [0], [0], [1], [0, 0, 1, 1], [], []>} : vector<8x8xbf16>, vector<8x8xbf16>, vector<8x8xf32> -> vector<8x8xf32>
    %c0_35 = arith.constant 0 : index
    %c16 = arith.constant 16 : index
    %72 = vector.load %arg8[%c0_35, %c16] : memref<8x32xf32, #tpu.memory_space<vmem>>, vector<8x8xf32>
    tpu.vector_store %arg8[%c0_35, %c16], %71 {strides = array<i32>} : memref<8x32xf32, #tpu.memory_space<vmem>>, vector<8x8xf32>,
    %73 = vector.extract_strided_slice %11 {offsets = [0, 24], sizes = [8, 8], strides = [1, 1]} : vector<8x32xbf16> to vector<8x8xbf16>
    %74 = vector.extract_strided_slice %12 {offsets = [0, 24], sizes = [8, 8], strides = [1, 1]} : vector<8x64xbf16> to vector<8x8xbf16>
    %75 = vector.extract_strided_slice %12 {offsets = [0, 56], sizes = [8, 8], strides = [1, 1]} : vector<8x64xbf16> to vector<8x8xbf16>
    "tpu.trace_start"() <{level = 10 : i32, message = "qd,kd->qk"}> : () -> ()
    %cst_36 = arith.constant dense<0.000000e+00> : vector<8x8xf32>
    %76 = tpu.matmul %73, %74, %cst_36 {dimension_numbers = #tpu.dot_dimension_numbers<[1], [1], [0], [0], [0, 0, 1, 0], [], []>} : vector<8x8xbf16>, vector<8x8xbf16>, vector<8x8xf32> -> vector<8x8xf32>
    "tpu.trace_stop"() : () -> ()
    %cst_37 = arith.constant dense<0xFF800000> : vector<8xf32>
    %77 = vector.multi_reduction <maximumf>, %76, %cst_37 [1] : vector<8x8xf32> to vector<8xf32>
    %78 = vector.shape_cast %77 : vector<8xf32> to vector<8x1xf32>
    %79 = vector.broadcast %78 : vector<8x1xf32> to vector<8x8xf32>
    %80 = arith.subf %76, %79 : vector<8x8xf32>
    %81 = math.exp %80 : vector<8x8xf32>
    %cst_38 = arith.constant dense<0.000000e+00> : vector<8xf32>
    %82 = vector.multi_reduction <add>, %81, %cst_38 [1] : vector<8x8xf32> to vector<8xf32>
    %83 = vector.shape_cast %82 : vector<8xf32> to vector<8x1xf32>
    %84 = tpu.reciprocal %83 {approx = true} : vector<8x1xf32> -> vector<8x1xf32>
    %85 = vector.broadcast %84 : vector<8x1xf32> to vector<8x8xf32>
    %86 = arith.mulf %81, %85 : vector<8x8xf32>
    %c0_39 = arith.constant 0 : index
    %c3 = arith.constant 3 : index
    %c0_40 = arith.constant 0 : index
    %c0_41 = arith.constant 0 : index
    %87 = vector.load %arg7[%c0_39, %c3, %c0_40, %c0_41] : memref<2x4x8x8xf32, #tpu.memory_space<vmem>>, vector<1x1x8x8xf32>
    %88 = vector.shape_cast %87 : vector<1x1x8x8xf32> to vector<8x8xf32>
    %89 = vector.shape_cast %86 : vector<8x8xf32> to vector<1x1x8x8xf32>
    tpu.vector_store %arg7[%c0_39, %c3, %c0_40, %c0_41], %89 {strides = array<i32>} : memref<2x4x8x8xf32, #tpu.memory_space<vmem>>, vector<1x1x8x8xf32>,
    %90 = arith.truncf %86 : vector<8x8xf32> to vector<8x8xbf16>
    %cst_42 = arith.constant dense<0.000000e+00> : vector<8x8xf32>
    %91 = tpu.matmul %90, %75, %cst_42 {dimension_numbers = #tpu.dot_dimension_numbers<[1], [0], [0], [1], [0, 0, 1, 1], [], []>} : vector<8x8xbf16>, vector<8x8xbf16>, vector<8x8xf32> -> vector<8x8xf32>
    %c0_43 = arith.constant 0 : index
    %c24 = arith.constant 24 : index
    %92 = vector.load %arg8[%c0_43, %c24] : memref<8x32xf32, #tpu.memory_space<vmem>>, vector<8x8xf32>
    tpu.vector_store %arg8[%c0_43, %c24], %91 {strides = array<i32>} : memref<8x32xf32, #tpu.memory_space<vmem>>, vector<8x8xf32>,
    %c0_44 = arith.constant 0 : index
    %c0_45 = arith.constant 0 : index
    %93 = vector.load %arg8[%c0_44, %c0_45] : memref<8x32xf32, #tpu.memory_space<vmem>>, vector<8x32xf32>
    %94 = arith.truncf %93 : vector<8x32xf32> to vector<8x32xbf16>
    %cst_46 = arith.constant dense<0.000000e+00> : vector<8x32xf32>
    %95 = tpu.matmul %94, %1, %cst_46 {dimension_numbers = #tpu.dot_dimension_numbers<[1], [0], [0], [1], [0, 0, 1, 1], [], []>} : vector<8x32xbf16>, vector<32x32xbf16>, vector<8x32xf32> -> vector<8x32xf32>
    %96 = vector.broadcast %3 : vector<1x32xf32> to vector<8x32xf32>
    %97 = arith.addf %95, %96 : vector<8x32xf32>
    %c0_47 = arith.constant 0 : index
    %c0_48 = arith.constant 0 : index
    %c0_49 = arith.constant 0 : index
    %98 = vector.load %arg6[%c0_47, %c0_48, %c0_49] : memref<2x8x32xf32, #tpu.memory_space<vmem>>, vector<1x8x32xf32>
    %99 = vector.shape_cast %98 : vector<1x8x32xf32> to vector<8x32xf32>
    %100 = vector.shape_cast %97 : vector<8x32xf32> to vector<1x8x32xf32>
    tpu.vector_store %arg6[%c0_47, %c0_48, %c0_49], %100 {strides = array<i32>} : memref<2x8x32xf32, #tpu.memory_space<vmem>>, vector<1x8x32xf32>,
    %c1_50 = arith.constant 1 : index
    %c0_51 = arith.constant 0 : index
    %c0_52 = arith.constant 0 : index
    %101 = vector.load %arg1[%c1_50, %c0_51, %c0_52] : memref<2x8x32xf32, #tpu.memory_space<vmem>>, vector<1x8x32xf32>
    %102 = vector.shape_cast %101 : vector<1x8x32xf32> to vector<8x32xf32>
    %103 = arith.truncf %102 : vector<8x32xf32> to vector<8x32xbf16>
    %cst_53 = arith.constant dense<0.000000e+00> : vector<8x96xf32>
    %104 = tpu.matmul %103, %0, %cst_53 {dimension_numbers = #tpu.dot_dimension_numbers<[1], [0], [0], [1], [0, 0, 1, 1], [], []>} : vector<8x32xbf16>, vector<32x96xbf16>, vector<8x96xf32> -> vector<8x96xf32>
    %105 = vector.broadcast %2 : vector<1x96xf32> to vector<8x96xf32>
    %106 = arith.addf %104, %105 : vector<8x96xf32>
    %107 = arith.truncf %106 : vector<8x96xf32> to vector<8x96xbf16>
    %108 = vector.extract_strided_slice %107 {offsets = [0, 0], sizes = [8, 32], strides = [1, 1]} : vector<8x96xbf16> to vector<8x32xbf16>
    %109 = vector.extract_strided_slice %107 {offsets = [0, 32], sizes = [8, 64], strides = [1, 1]} : vector<8x96xbf16> to vector<8x64xbf16>
    %110 = vector.extract_strided_slice %108 {offsets = [0, 0], sizes = [8, 8], strides = [1, 1]} : vector<8x32xbf16> to vector<8x8xbf16>
    %111 = vector.extract_strided_slice %109 {offsets = [0, 0], sizes = [8, 8], strides = [1, 1]} : vector<8x64xbf16> to vector<8x8xbf16>
    %112 = vector.extract_strided_slice %109 {offsets = [0, 32], sizes = [8, 8], strides = [1, 1]} : vector<8x64xbf16> to vector<8x8xbf16>
    "tpu.trace_start"() <{level = 10 : i32, message = "qd,kd->qk"}> : () -> ()
    %cst_54 = arith.constant dense<0.000000e+00> : vector<8x8xf32>
    %113 = tpu.matmul %110, %111, %cst_54 {dimension_numbers = #tpu.dot_dimension_numbers<[1], [1], [0], [0], [0, 0, 1, 0], [], []>} : vector<8x8xbf16>, vector<8x8xbf16>, vector<8x8xf32> -> vector<8x8xf32>
    "tpu.trace_stop"() : () -> ()
    %cst_55 = arith.constant dense<0xFF800000> : vector<8xf32>
    %114 = vector.multi_reduction <maximumf>, %113, %cst_55 [1] : vector<8x8xf32> to vector<8xf32>
    %115 = vector.shape_cast %114 : vector<8xf32> to vector<8x1xf32>
    %116 = vector.broadcast %115 : vector<8x1xf32> to vector<8x8xf32>
    %117 = arith.subf %113, %116 : vector<8x8xf32>
    %118 = math.exp %117 : vector<8x8xf32>
    %cst_56 = arith.constant dense<0.000000e+00> : vector<8xf32>
    %119 = vector.multi_reduction <add>, %118, %cst_56 [1] : vector<8x8xf32> to vector<8xf32>
    %120 = vector.shape_cast %119 : vector<8xf32> to vector<8x1xf32>
    %121 = tpu.reciprocal %120 {approx = true} : vector<8x1xf32> -> vector<8x1xf32>
    %122 = vector.broadcast %121 : vector<8x1xf32> to vector<8x8xf32>
    %123 = arith.mulf %118, %122 : vector<8x8xf32>
    %c1_57 = arith.constant 1 : index
    %c0_58 = arith.constant 0 : index
    %c0_59 = arith.constant 0 : index
    %c0_60 = arith.constant 0 : index
    %124 = vector.load %arg7[%c1_57, %c0_58, %c0_59, %c0_60] : memref<2x4x8x8xf32, #tpu.memory_space<vmem>>, vector<1x1x8x8xf32>
    %125 = vector.shape_cast %124 : vector<1x1x8x8xf32> to vector<8x8xf32>
    %126 = vector.shape_cast %123 : vector<8x8xf32> to vector<1x1x8x8xf32>
    tpu.vector_store %arg7[%c1_57, %c0_58, %c0_59, %c0_60], %126 {strides = array<i32>} : memref<2x4x8x8xf32, #tpu.memory_space<vmem>>, vector<1x1x8x8xf32>,
    %127 = arith.truncf %123 : vector<8x8xf32> to vector<8x8xbf16>
    %cst_61 = arith.constant dense<0.000000e+00> : vector<8x8xf32>
    %128 = tpu.matmul %127, %112, %cst_61 {dimension_numbers = #tpu.dot_dimension_numbers<[1], [0], [0], [1], [0, 0, 1, 1], [], []>} : vector<8x8xbf16>, vector<8x8xbf16>, vector<8x8xf32> -> vector<8x8xf32>
    %c0_62 = arith.constant 0 : index
    %c0_63 = arith.constant 0 : index
    %129 = vector.load %arg8[%c0_62, %c0_63] : memref<8x32xf32, #tpu.memory_space<vmem>>, vector<8x8xf32>
    tpu.vector_store %arg8[%c0_62, %c0_63], %128 {strides = array<i32>} : memref<8x32xf32, #tpu.memory_space<vmem>>, vector<8x8xf32>,
    %130 = vector.extract_strided_slice %108 {offsets = [0, 8], sizes = [8, 8], strides = [1, 1]} : vector<8x32xbf16> to vector<8x8xbf16>
    %131 = vector.extract_strided_slice %109 {offsets = [0, 8], sizes = [8, 8], strides = [1, 1]} : vector<8x64xbf16> to vector<8x8xbf16>
    %132 = vector.extract_strided_slice %109 {offsets = [0, 40], sizes = [8, 8], strides = [1, 1]} : vector<8x64xbf16> to vector<8x8xbf16>
    "tpu.trace_start"() <{level = 10 : i32, message = "qd,kd->qk"}> : () -> ()
    %cst_64 = arith.constant dense<0.000000e+00> : vector<8x8xf32>
    %133 = tpu.matmul %130, %131, %cst_64 {dimension_numbers = #tpu.dot_dimension_numbers<[1], [1], [0], [0], [0, 0, 1, 0], [], []>} : vector<8x8xbf16>, vector<8x8xbf16>, vector<8x8xf32> -> vector<8x8xf32>
    "tpu.trace_stop"() : () -> ()
    %cst_65 = arith.constant dense<0xFF800000> : vector<8xf32>
    %134 = vector.multi_reduction <maximumf>, %133, %cst_65 [1] : vector<8x8xf32> to vector<8xf32>
    %135 = vector.shape_cast %134 : vector<8xf32> to vector<8x1xf32>
    %136 = vector.broadcast %135 : vector<8x1xf32> to vector<8x8xf32>
    %137 = arith.subf %133, %136 : vector<8x8xf32>
    %138 = math.exp %137 : vector<8x8xf32>
    %cst_66 = arith.constant dense<0.000000e+00> : vector<8xf32>
    %139 = vector.multi_reduction <add>, %138, %cst_66 [1] : vector<8x8xf32> to vector<8xf32>
    %140 = vector.shape_cast %139 : vector<8xf32> to vector<8x1xf32>
    %141 = tpu.reciprocal %140 {approx = true} : vector<8x1xf32> -> vector<8x1xf32>
    %142 = vector.broadcast %141 : vector<8x1xf32> to vector<8x8xf32>
    %143 = arith.mulf %138, %142 : vector<8x8xf32>
    %c1_67 = arith.constant 1 : index
    %c1_68 = arith.constant 1 : index
    %c0_69 = arith.constant 0 : index
    %c0_70 = arith.constant 0 : index
    %144 = vector.load %arg7[%c1_67, %c1_68, %c0_69, %c0_70] : memref<2x4x8x8xf32, #tpu.memory_space<vmem>>, vector<1x1x8x8xf32>
    %145 = vector.shape_cast %144 : vector<1x1x8x8xf32> to vector<8x8xf32>
    %146 = vector.shape_cast %143 : vector<8x8xf32> to vector<1x1x8x8xf32>
    tpu.vector_store %arg7[%c1_67, %c1_68, %c0_69, %c0_70], %146 {strides = array<i32>} : memref<2x4x8x8xf32, #tpu.memory_space<vmem>>, vector<1x1x8x8xf32>,
    %147 = arith.truncf %143 : vector<8x8xf32> to vector<8x8xbf16>
    %cst_71 = arith.constant dense<0.000000e+00> : vector<8x8xf32>
    %148 = tpu.matmul %147, %132, %cst_71 {dimension_numbers = #tpu.dot_dimension_numbers<[1], [0], [0], [1], [0, 0, 1, 1], [], []>} : vector<8x8xbf16>, vector<8x8xbf16>, vector<8x8xf32> -> vector<8x8xf32>
    %c0_72 = arith.constant 0 : index
    %c8_73 = arith.constant 8 : index
    %149 = vector.load %arg8[%c0_72, %c8_73] : memref<8x32xf32, #tpu.memory_space<vmem>>, vector<8x8xf32>
    tpu.vector_store %arg8[%c0_72, %c8_73], %148 {strides = array<i32>} : memref<8x32xf32, #tpu.memory_space<vmem>>, vector<8x8xf32>,
    %150 = vector.extract_strided_slice %108 {offsets = [0, 16], sizes = [8, 8], strides = [1, 1]} : vector<8x32xbf16> to vector<8x8xbf16>
    %151 = vector.extract_strided_slice %109 {offsets = [0, 16], sizes = [8, 8], strides = [1, 1]} : vector<8x64xbf16> to vector<8x8xbf16>
    %152 = vector.extract_strided_slice %109 {offsets = [0, 48], sizes = [8, 8], strides = [1, 1]} : vector<8x64xbf16> to vector<8x8xbf16>
    "tpu.trace_start"() <{level = 10 : i32, message = "qd,kd->qk"}> : () -> ()
    %cst_74 = arith.constant dense<0.000000e+00> : vector<8x8xf32>
    %153 = tpu.matmul %150, %151, %cst_74 {dimension_numbers = #tpu.dot_dimension_numbers<[1], [1], [0], [0], [0, 0, 1, 0], [], []>} : vector<8x8xbf16>, vector<8x8xbf16>, vector<8x8xf32> -> vector<8x8xf32>
    "tpu.trace_stop"() : () -> ()
    %cst_75 = arith.constant dense<0xFF800000> : vector<8xf32>
    %154 = vector.multi_reduction <maximumf>, %153, %cst_75 [1] : vector<8x8xf32> to vector<8xf32>
    %155 = vector.shape_cast %154 : vector<8xf32> to vector<8x1xf32>
    %156 = vector.broadcast %155 : vector<8x1xf32> to vector<8x8xf32>
    %157 = arith.subf %153, %156 : vector<8x8xf32>
    %158 = math.exp %157 : vector<8x8xf32>
    %cst_76 = arith.constant dense<0.000000e+00> : vector<8xf32>
    %159 = vector.multi_reduction <add>, %158, %cst_76 [1] : vector<8x8xf32> to vector<8xf32>
    %160 = vector.shape_cast %159 : vector<8xf32> to vector<8x1xf32>
    %161 = tpu.reciprocal %160 {approx = true} : vector<8x1xf32> -> vector<8x1xf32>
    %162 = vector.broadcast %161 : vector<8x1xf32> to vector<8x8xf32>
    %163 = arith.mulf %158, %162 : vector<8x8xf32>
    %c1_77 = arith.constant 1 : index
    %c2_78 = arith.constant 2 : index
    %c0_79 = arith.constant 0 : index
    %c0_80 = arith.constant 0 : index
    %164 = vector.load %arg7[%c1_77, %c2_78, %c0_79, %c0_80] : memref<2x4x8x8xf32, #tpu.memory_space<vmem>>, vector<1x1x8x8xf32>
    %165 = vector.shape_cast %164 : vector<1x1x8x8xf32> to vector<8x8xf32>
    %166 = vector.shape_cast %163 : vector<8x8xf32> to vector<1x1x8x8xf32>
    tpu.vector_store %arg7[%c1_77, %c2_78, %c0_79, %c0_80], %166 {strides = array<i32>} : memref<2x4x8x8xf32, #tpu.memory_space<vmem>>, vector<1x1x8x8xf32>,
    %167 = arith.truncf %163 : vector<8x8xf32> to vector<8x8xbf16>
    %cst_81 = arith.constant dense<0.000000e+00> : vector<8x8xf32>
    %168 = tpu.matmul %167, %152, %cst_81 {dimension_numbers = #tpu.dot_dimension_numbers<[1], [0], [0], [1], [0, 0, 1, 1], [], []>} : vector<8x8xbf16>, vector<8x8xbf16>, vector<8x8xf32> -> vector<8x8xf32>
    %c0_82 = arith.constant 0 : index
    %c16_83 = arith.constant 16 : index
    %169 = vector.load %arg8[%c0_82, %c16_83] : memref<8x32xf32, #tpu.memory_space<vmem>>, vector<8x8xf32>
    tpu.vector_store %arg8[%c0_82, %c16_83], %168 {strides = array<i32>} : memref<8x32xf32, #tpu.memory_space<vmem>>, vector<8x8xf32>,
    %170 = vector.extract_strided_slice %108 {offsets = [0, 24], sizes = [8, 8], strides = [1, 1]} : vector<8x32xbf16> to vector<8x8xbf16>
    %171 = vector.extract_strided_slice %109 {offsets = [0, 24], sizes = [8, 8], strides = [1, 1]} : vector<8x64xbf16> to vector<8x8xbf16>
    %172 = vector.extract_strided_slice %109 {offsets = [0, 56], sizes = [8, 8], strides = [1, 1]} : vector<8x64xbf16> to vector<8x8xbf16>
    "tpu.trace_start"() <{level = 10 : i32, message = "qd,kd->qk"}> : () -> ()
    %cst_84 = arith.constant dense<0.000000e+00> : vector<8x8xf32>
    %173 = tpu.matmul %170, %171, %cst_84 {dimension_numbers = #tpu.dot_dimension_numbers<[1], [1], [0], [0], [0, 0, 1, 0], [], []>} : vector<8x8xbf16>, vector<8x8xbf16>, vector<8x8xf32> -> vector<8x8xf32>
    "tpu.trace_stop"() : () -> ()
    %cst_85 = arith.constant dense<0xFF800000> : vector<8xf32>
    %174 = vector.multi_reduction <maximumf>, %173, %cst_85 [1] : vector<8x8xf32> to vector<8xf32>
    %175 = vector.shape_cast %174 : vector<8xf32> to vector<8x1xf32>
    %176 = vector.broadcast %175 : vector<8x1xf32> to vector<8x8xf32>
    %177 = arith.subf %173, %176 : vector<8x8xf32>
    %178 = math.exp %177 : vector<8x8xf32>
    %cst_86 = arith.constant dense<0.000000e+00> : vector<8xf32>
    %179 = vector.multi_reduction <add>, %178, %cst_86 [1] : vector<8x8xf32> to vector<8xf32>
    %180 = vector.shape_cast %179 : vector<8xf32> to vector<8x1xf32>
    %181 = tpu.reciprocal %180 {approx = true} : vector<8x1xf32> -> vector<8x1xf32>
    %182 = vector.broadcast %181 : vector<8x1xf32> to vector<8x8xf32>
    %183 = arith.mulf %178, %182 : vector<8x8xf32>
    %c1_87 = arith.constant 1 : index
    %c3_88 = arith.constant 3 : index
    %c0_89 = arith.constant 0 : index
    %c0_90 = arith.constant 0 : index
    %184 = vector.load %arg7[%c1_87, %c3_88, %c0_89, %c0_90] : memref<2x4x8x8xf32, #tpu.memory_space<vmem>>, vector<1x1x8x8xf32>
    %185 = vector.shape_cast %184 : vector<1x1x8x8xf32> to vector<8x8xf32>
    %186 = vector.shape_cast %183 : vector<8x8xf32> to vector<1x1x8x8xf32>
    tpu.vector_store %arg7[%c1_87, %c3_88, %c0_89, %c0_90], %186 {strides = array<i32>} : memref<2x4x8x8xf32, #tpu.memory_space<vmem>>, vector<1x1x8x8xf32>,
    %187 = arith.truncf %183 : vector<8x8xf32> to vector<8x8xbf16>
    %cst_91 = arith.constant dense<0.000000e+00> : vector<8x8xf32>
    %188 = tpu.matmul %187, %172, %cst_91 {dimension_numbers = #tpu.dot_dimension_numbers<[1], [0], [0], [1], [0, 0, 1, 1], [], []>} : vector<8x8xbf16>, vector<8x8xbf16>, vector<8x8xf32> -> vector<8x8xf32>
    %c0_92 = arith.constant 0 : index
    %c24_93 = arith.constant 24 : index
    %189 = vector.load %arg8[%c0_92, %c24_93] : memref<8x32xf32, #tpu.memory_space<vmem>>, vector<8x8xf32>
    tpu.vector_store %arg8[%c0_92, %c24_93], %188 {strides = array<i32>} : memref<8x32xf32, #tpu.memory_space<vmem>>, vector<8x8xf32>,
    %c0_94 = arith.constant 0 : index
    %c0_95 = arith.constant 0 : index
    %190 = vector.load %arg8[%c0_94, %c0_95] : memref<8x32xf32, #tpu.memory_space<vmem>>, vector<8x32xf32>
    %191 = arith.truncf %190 : vector<8x32xf32> to vector<8x32xbf16>
    %cst_96 = arith.constant dense<0.000000e+00> : vector<8x32xf32>
    %192 = tpu.matmul %191, %1, %cst_96 {dimension_numbers = #tpu.dot_dimension_numbers<[1], [0], [0], [1], [0, 0, 1, 1], [], []>} : vector<8x32xbf16>, vector<32x32xbf16>, vector<8x32xf32> -> vector<8x32xf32>
    %193 = vector.broadcast %3 : vector<1x32xf32> to vector<8x32xf32>
    %194 = arith.addf %192, %193 : vector<8x32xf32>
    %c1_97 = arith.constant 1 : index
    %c0_98 = arith.constant 0 : index
    %c0_99 = arith.constant 0 : index
    %195 = vector.load %arg6[%c1_97, %c0_98, %c0_99] : memref<2x8x32xf32, #tpu.memory_space<vmem>>, vector<1x8x32xf32>
    %196 = vector.shape_cast %195 : vector<1x8x32xf32> to vector<8x32xf32>
    %197 = vector.shape_cast %194 : vector<8x32xf32> to vector<1x8x32xf32>
    tpu.vector_store %arg6[%c1_97, %c0_98, %c0_99], %197 {strides = array<i32>} : memref<2x8x32xf32, #tpu.memory_space<vmem>>, vector<1x8x32xf32>,
    return
  }
  func.func @transform_0(%arg0: i32) -> (i32, i32, i32) {
    %c0_i32 = arith.constant 0 : i32
    %c0_i32_0 = arith.constant 0 : i32
    %c0_i32_1 = arith.constant 0 : i32
    return %arg0, %c0_i32, %c0_i32_0 : i32, i32, i32
  }
  func.func @transform_1(%arg0: i32) -> (i32, i32) {
    %c0_i32 = arith.constant 0 : i32
    %c0_i32_0 = arith.constant 0 : i32
    %c0_i32_1 = arith.constant 0 : i32
    return %c0_i32, %c0_i32_0 : i32, i32
  }
  func.func @transform_2(%arg0: i32) -> (i32, i32) {
    %c0_i32 = arith.constant 0 : i32
    %c0_i32_0 = arith.constant 0 : i32
    %c0_i32_1 = arith.constant 0 : i32
    return %c0_i32, %c0_i32_0 : i32, i32
  }
  func.func @transform_3(%arg0: i32) -> (i32, i32) {
    %c0_i32 = arith.constant 0 : i32
    %c0_i32_0 = arith.constant 0 : i32
    %c0_i32_1 = arith.constant 0 : i32
    return %c0_i32, %c0_i32_0 : i32, i32
  }
  func.func @transform_4(%arg0: i32) -> (i32, i32) {
    %c0_i32 = arith.constant 0 : i32
    %c0_i32_0 = arith.constant 0 : i32
    %c0_i32_1 = arith.constant 0 : i32
    return %c0_i32, %c0_i32_0 : i32, i32
  }
  func.func @transform_5(%arg0: i32) -> (i32, i32, i32) {
    %c0_i32 = arith.constant 0 : i32
    %c0_i32_0 = arith.constant 0 : i32
    %c0_i32_1 = arith.constant 0 : i32
    return %arg0, %c0_i32, %c0_i32_0 : i32, i32, i32
  }
  func.func @transform_6(%arg0: i32) -> (i32, i32, i32, i32) {
    %c0_i32 = arith.constant 0 : i32
    %c0_i32_0 = arith.constant 0 : i32
    %c0_i32_1 = arith.constant 0 : i32
    %c0_i32_2 = arith.constant 0 : i32
    return %arg0, %c0_i32, %c0_i32_0, %c0_i32_1 : i32, i32, i32, i32
  }
}

</mosaic_0001>

<bundles_post_ra>
// kernel: tpu_custom_call.1
= control target key start
LH: loop header
LB: loop body
LE: loop exit
PB: predicated region body
PF: predicated region fallthrough
CT: control target
= control target key end

     0   :  { %12 = vsyncpa [#allocation4], 0  ;;  %s1991_s0 = inlined_call_operand.hbm [shape: f32[2,8,32], index: 0, kind: input, shape index: {}]   ;;  %s1992_s1 = inlined_call_operand.hbm [shape: bf16[32,96], index: 1, kind: input, shape index: {}]   ;;  %s1993_s2 = inlined_call_operand.vmem [shape: f32[1,96], index: 2, kind: input, shape index: {}]   ;;  %s1994_s3 = inlined_call_operand.hbm [shape: bf16[32,32], index: 3, kind: input, shape index: {}]   ;;  %s1995_s4 = inlined_call_operand.vmem [shape: f32[1,32], index: 4, kind: input, shape index: {}]   ;;  %s1996_s5 = inlined_call_operand.hbm [shape: f32[2,8,32], index: 5, kind: output, shape index: {0}]   ;;  %s1997_s6 = inlined_call_operand.hbm [shape: f32[2,4,8,8], index: 6, kind: output, shape index: {1}]  }
   0x1   :  { %13 = vsyncpa [#allocation7], 0 }
   0x2   :  { %14 = vsyncpa [#allocation5], 0 }
   0x3   :  { %15 = vsyncpa [#allocation11], 0  ;;  %s1638_s21 = smov [#allocation6]   ;;  %s1520_s25 = scalar_lea.hbm %s1992_s1, 256 }
   0x4   :  { %s33_s22 = sshll.u32 %s1638_s21, 4  ;;  %p1521_p0 = scmp.ne.s32.totalorder %s1992_s1, %s1520_s25  ;;  %s34_s22 = int_to_ptr.vmem [resolvable:$true] %s33_s22 }
   0x5   :  { %p1524_p1 = scmp.lt.u32.totalorder %s1520_s25, %s1992_s1 }
   0x7   :  { %p1526_p2 = pnand %p1524_p1, %p1521_p0 }
   0x9   :  { %1529 = shalt.err (!%p1526_p2)
}
   0xa   :  { %s1530_s30 = scalar_lea.vmem %s34_s22, 256  ;;  %p1535_p4 = scmp.lt.s32.totalorder %s34_s22, %s34_s22 }
   0xb   :  { %p1531_p3 = scmp.ne.s32.totalorder %s34_s22, %s1530_s30  ;;  %p1536_p5 = scmp.lt.s32.totalorder %s1530_s30, %s1530_s30 }
   0xd   :  { %p1537_p6 = por %p1536_p5, %p1535_p4 }
   0xf   :  { %p1538_p7 = pnand %p1537_p6, %p1531_p3 }
  0x11   :  { %1541 = shalt.err (!%p1538_p7)
}
  0x12   :  { %s1639_s7 = smov 64   ;;  %s1640_s8 = smov 4  }
  0x13   :  { %39 = dma.hbm_to_vmem [thread:$0]  %s1992_s1, 256, %s34_s22, [#allocation7], %s1639_s7, %s1639_s7, %s1640_s8  }
  0x14   :  { %s1641_s11 = smov [#allocation3]   ;;  %s1542_s15 = scalar_lea.hbm %s1991_s0, 256 }
  0x15   :  { %s21_s12 = sshll.u32 %s1641_s11, 4  ;;  %p1543_p8 = scmp.ne.s32.totalorder %s1991_s0, %s1542_s15  ;;  %s22_s12 = int_to_ptr.vmem [resolvable:$true] %s21_s12 }
  0x16   :  { %p1546_p9 = scmp.lt.u32.totalorder %s1542_s15, %s1991_s0 }
  0x18   :  { %p1548_p10 = pnand %p1546_p9, %p1543_p8 }
  0x1a   :  { %1551 = shalt.err (!%p1548_p10)
}
  0x1b   :  { %s1552_s20 = scalar_lea.vmem %s22_s12, 256  ;;  %p1557_p12 = scmp.lt.s32.totalorder %s22_s12, %s22_s12 }
  0x1c   :  { %p1553_p11 = scmp.ne.s32.totalorder %s22_s12, %s1552_s20  ;;  %p1558_p13 = scmp.lt.s32.totalorder %s1552_s20, %s1552_s20 }
  0x1e   :  { %p1559_p0 = por %p1558_p13, %p1557_p12 }
  0x20   :  { %p1560_p1 = pnand %p1559_p0, %p1553_p11 }
  0x22   :  { %1563 = shalt.err (!%p1560_p1)
}
  0x23   :  { %s1642_s1 = smov 128   ;;  %s1643_s21 = smov 8  }
  0x24   :  { %27 = dma.hbm_to_vmem [thread:$0]  %s1991_s0, 256, %s22_s12, [#allocation4], %s1642_s1, %s1642_s1, %s1643_s21  }
  0x25   :  { %s1644_s24 = smov [#allocation8]   ;;  %s1564_s28 = scalar_lea.hbm %s1994_s3, 256 }
  0x26   :  { %s47_s25 = sshll.u32 %s1644_s24, 4  ;;  %p1565_p2 = scmp.ne.s32.totalorder %s1994_s3, %s1564_s28  ;;  %s48_s25 = int_to_ptr.vmem [resolvable:$true] %s47_s25 }
  0x27   :  { %p1568_p3 = scmp.lt.u32.totalorder %s1564_s28, %s1994_s3 }
  0x29   :  { %p1570_p4 = pnand %p1568_p3, %p1565_p2 }
  0x2b   :  { %1573 = shalt.err (!%p1570_p4)
}
  0x2c   :  { %s1574_s11 = scalar_lea.vmem %s48_s25, 256  ;;  %p1579_p6 = scmp.lt.s32.totalorder %s48_s25, %s48_s25 }
  0x2d   :  { %p1575_p5 = scmp.ne.s32.totalorder %s48_s25, %s1574_s11  ;;  %p1580_p7 = scmp.lt.s32.totalorder %s1574_s11, %s1574_s11 }
  0x2f   :  { %p1581_p8 = por %p1580_p7, %p1579_p6 }
  0x31   :  { %p1582_p9 = pnand %p1581_p8, %p1575_p5 }
  0x33   :  { %1585 = shalt.err (!%p1582_p9)
}
  0x34   :  { %53 = dma.hbm_to_vmem [thread:$0]  %s1994_s3, 256, %s48_s25, [#allocation7], %s1639_s7, %s1639_s7, %s1640_s8  }
  0x35   :  { %1630 = dma.done.wait [#allocation4], 256  }
  0x36   :  { %1631 = vsyncadd [#allocation4], 4294967040 }
  0x37   :  { %1632 = dma.done.wait [#allocation7], 512  }
  0x38   :  { %1633 = vsyncadd [#allocation7], 4294966784  ;;  %v1645_v0 = vmov 0.0   ;;  %vm1646_vm0 = vmmov 0   ;;  %v1747_v1 = vld [vmem:[#allocation6] sm:$0xff]   ;;  %v1750_v2 = vld [vmem:[#allocation6 + $0x8] sm:$0xff]  }
  0x39   :  { %1333 = vmatprep.subr.bf16.mxu0 %v1645_v0  ;;  %1337 = vmatprep.mubr.msk.bf16.mxu0 %vm1646_vm0, %v1645_v0  ;;  %v76_v3 = vld [vmem:[#allocation3] sm:$0xff]  ;;  %vm96_vm1 = vcmask 261120   ;;  %v1761_v5 = vld [vmem:[%s1993_s2] ss:$0 sm:$0xff]  ;;  %s1647_s13 = smov 120   ;;  %s1648_s14 = smov 96  }
  0x3a   :  { %1341 = vmatprep.subr.bf16.mxu1 %v1645_v0  ;;  %1343 = vmatprep.mubr.msk.bf16.mxu1 %vm1646_vm0, %v1645_v0  ;;  %v77_v4 = vpack.c.bf16 %v76_v3, %v76_v3  ;;  %s1649_s15 = smov 80   ;;  %s1650_s2 = smov 88   ;;  %vm144_vm2 = vcmask 64512   ;;  %vm209_vm3 = vcmask 1043456   ;;  %vm370_vm4 = vcmask 130112  }
  0x3b   :  { %1334 = vmatpush3.bf16.msra.mxu0 %v1747_v1  ;;  %s1651_s16 = smov 72   ;;  %s1652_s17 = smov 112   ;;  %vm488_vm5 = vcmask 195712   ;;  %vm606_vm6 = vcmask 261312  }
  0x3c   :  { %1335 = vmatprep.subr.bf16.mxu0 %v1645_v0  ;;  %s1653_s18 = smov 104   ;;  %s1654_s19 = smov 56  }
  0x3d   :  { %s1655_s20 = smov 40   ;;  %s1656_s22 = smov 48  }
  0x3e   :  { %s1657_s23 = smov 16   ;;  %s1658_s24 = smov 24  }
  0x3f   :  { %1336 = vmatpush3.bf16.msra.mxu0 %v1750_v2 }
  0x40   :  { %1347 = vmatprep.subr.bf16.mxu0 %v1645_v0 }
  0x42   :  { %1338 = vmatmul.mubr.msk.bf16.vlgmr.msra.gmra.mrb[0].mxu0 %vm96_vm1, %v77_v4 }
  0x43   :  { %1349 = vmatprep.mubr.msk.bf16.mxu0 %vm1646_vm0, %v1645_v0 }
 0x115   :  { %v134_v6 = vpop.f32.mrb[0].mxu0 }
 0x116   :  { %v135_v7 = vadd.f32 %v1761_v5, %v134_v6  ;;  %v1339_v8 = vpop.f32.mrb[1].mxu0 }
 0x117   :  { %v137_v9 = vpop.f32.mrb[2].mxu0 }
 0x118   :  { %v1764_v10 = vpack.c.bf16 %v135_v7, %v135_v7  ;;  %v1340_v11 = vpop.f32.mrb[3].mxu0 }
 0x11a   :  { %254 = vrot.lane.b32.xlu1 %v1764_v10, %s1647_s13  ;;  %142 = vrot.lane.b32.xlu0 %v1764_v10, %s1648_s14 }
 0x11e   :  { %374 = vrot.lane.b32.xlu1 %v1764_v10, %s1649_s15  ;;  %256 = vrot.lane.b32.xlu0 %v1764_v10, %s1650_s2 }
 0x122   :  { %492 = vrot.lane.b32.xlu1 %v1764_v10, %s1651_s16  ;;  %372 = vrot.lane.b32.xlu0 %v1764_v10, %s1652_s17 }
 0x126   :  { %490 = vrot.lane.b32.xlu0 %v1764_v10, %s1653_s18 }
 0x18c   :  { %v143_v12 = vpop.permute.xlu0 %142  ;;  %v255_v15 = vpop.permute.xlu1 %254 }
 0x18d   :  { %v149_v13 = vsel %vm144_vm2, %v143_v12, 0 }
 0x18e   :  { %1342 = vmatpush3.bf16.xpose.msra.mxu1 %v149_v13 }
 0x18f   :  { %1353 = vmatprep.subr.bf16.mxu1 %v1645_v0 }
 0x190   :  { %v257_v14 = vpop.permute.xlu0 %256  ;;  %v375_v17 = vpop.permute.xlu1 %374 }
 0x191   :  { %v262_v16 = vsel %vm144_vm2, %v257_v14, 0  ;;  %v380_v18 = vsel %vm144_vm2, %v375_v17, 0 }
 0x194   :  { %v493_v19 = vpop.permute.xlu1 %492  ;;  %v373_v20 = vpop.permute.xlu0 %372 }
 0x195   :  { %1344 = vmatmul.mubr.msk.bf16.vlgmr.msra.gmra.mrb[0].mxu1 %vm144_vm2, %v1764_v10  ;;  %v498_v21 = vsel %vm144_vm2, %v493_v19, 0 }
 0x196   :  { %1354 = vmatpush3.bf16.xpose.msra.mxu1 %v262_v16  ;;  %1355 = vmatprep.mubr.msk.bf16.mxu1 %vm1646_vm0, %v1645_v0 }
 0x197   :  { %1365 = vmatprep.subr.bf16.mxu1 %v1645_v0 }
 0x198   :  { %v491_v22 = vpop.permute.xlu0 %490 }
 0x19d   :  { %1356 = vmatmul.mubr.msk.bf16.vlgmr.msra.gmra.mrb[4].mxu1 %vm144_vm2, %v255_v15 }
 0x19e   :  { %1366 = vmatpush3.bf16.xpose.msra.mxu1 %v380_v18  ;;  %1367 = vmatprep.mubr.msk.bf16.mxu1 %vm1646_vm0, %v1645_v0 }
 0x19f   :  { %1377 = vmatprep.subr.bf16.mxu1 %v1645_v0 }
 0x1a5   :  { %1368 = vmatmul.mubr.msk.bf16.vlgmr.msra.gmra.mrb[8].mxu1 %vm144_vm2, %v373_v20 }
 0x1a6   :  { %1378 = vmatpush3.bf16.xpose.msra.mxu1 %v498_v21  ;;  %1379 = vmatprep.mubr.msk.bf16.mxu1 %vm1646_vm0, %v1645_v0 }
 0x1a7   :  { %1389 = vmatprep.subr.bf16.mxu1 %v1645_v0 }
 0x1ad   :  { %1380 = vmatmul.mubr.msk.bf16.vlgmr.msra.gmra.mrb[12].mxu1 %vm144_vm2, %v491_v22 }
 0x1ae   :  { %1393 = vmatprep.mubr.msk.bf16.mxu1 %vm1646_vm0, %v1645_v0 }
 0x268   :  { %v185_v23 = vpop.f32.mrb[0].mxu1 }
 0x269   :  { %v1345_v24 = vpop.f32.mrb[1].mxu1  ;;  %v191_v25 = vsel %vm144_vm2, %v185_v23, -inf }
 0x26a   :  { %192 = vmax.xlane.f32.xlu1 %v191_v25  ;;  %v188_v26 = vpop.f32.mrb[2].mxu1 }
 0x26b   :  { %v1346_v27 = vpop.f32.mrb[3].mxu1 }
 0x26c   :  { %v673_v27 = vld [vmem:[#allocation3 + $0x8] sm:$0xff] }
 0x270   :  { %v298_v28 = vpop.f32.mrb[4].mxu1 }
 0x271   :  { %v1357_v29 = vpop.f32.mrb[5].mxu1  ;;  %v304_v30 = vsel %vm144_vm2, %v298_v28, -inf }
 0x272   :  { %305 = vmax.xlane.f32.xlu0 %v304_v30  ;;  %v301_v31 = vpop.f32.mrb[6].mxu1 }
 0x273   :  { %v1358_v32 = vpop.f32.mrb[7].mxu1 }
 0x278   :  { %v416_v33 = vpop.f32.mrb[8].mxu1 }
 0x279   :  { %v1369_v34 = vpop.f32.mrb[9].mxu1  ;;  %v422_v35 = vsel %vm144_vm2, %v416_v33, -inf }
 0x27a   :  { %423 = vmax.xlane.f32.xlu0 %v422_v35  ;;  %v419_v36 = vpop.f32.mrb[10].mxu1 }
 0x27b   :  { %v1370_v37 = vpop.f32.mrb[11].mxu1  ;;  %v1853_v36 = vld [vmem:[#allocation8 + $0x8] sm:$0xff]  }
 0x280   :  { %v534_v38 = vpop.f32.mrb[12].mxu1 }
 0x281   :  { %v1381_v39 = vpop.f32.mrb[13].mxu1  ;;  %v540_v40 = vsel %vm144_vm2, %v534_v38, -inf }
 0x282   :  { %541 = vmax.xlane.f32.xlu1 %v540_v40  ;;  %v537_v41 = vpop.f32.mrb[14].mxu1 }
 0x283   :  { %v1382_v42 = vpop.f32.mrb[15].mxu1 }
 0x2f7   :  { %v193_v43 = vpop.xlane.xlu1 %192 }
 0x2f8   :  { %v194_v44 = vsub.f32 %v185_v23, %v193_v43 }
 0x2fa   :  { %v195_v45 = vmul.f32 1.442695, %v194_v44 }
 0x2fc   :  { %1488 = vpow2.f32 %v195_v45 }
 0x2ff   :  { %v306_v46 = vpop.xlane.xlu0 %305 }
 0x300   :  { %v307_v47 = vsub.f32 %v298_v28, %v306_v46  ;;  %v674_v28 = vpack.c.bf16 %v673_v27, %v673_v27 }
 0x302   :  { %v308_v48 = vmul.f32 1.442695, %v307_v47 }
 0x304   :  { %1490 = vpow2.f32 %v308_v48 }
 0x306   :  { %v1489_v49 = vpop.eup %1488 }
 0x307   :  { %v424_v50 = vpop.xlane.xlu0 %423  ;;  %v197_v51 = vsel %vm144_vm2, %v1489_v49, 0.0 }
 0x308   :  { %v425_v52 = vsub.f32 %v416_v33, %v424_v50  ;;  %198 = vadd.xlane.f32.xlu0 %v197_v51 }
 0x30a   :  { %v426_v53 = vmul.f32 1.442695, %v425_v52 }
 0x30c   :  { %1492 = vpow2.f32 %v426_v53 }
 0x30e   :  { %v1491_v54 = vpop.eup %1490 }
 0x30f   :  { %v310_v55 = vsel %vm144_vm2, %v1491_v54, 0.0  ;;  %v542_v58 = vpop.xlane.xlu1 %541 }
 0x310   :  { %311 = vadd.xlane.f32.xlu1 %v310_v55  ;;  %v543_v59 = vsub.f32 %v534_v38, %v542_v58 }
 0x312   :  { %v544_v60 = vmul.f32 1.442695, %v543_v59 }
 0x314   :  { %1494 = vpow2.f32 %v544_v60 }
 0x316   :  { %v1493_v56 = vpop.eup %1492 }
 0x317   :  { %v428_v57 = vsel %vm144_vm2, %v1493_v56, 0.0 }
 0x318   :  { %429 = vadd.xlane.f32.xlu0 %v428_v57 }
 0x31e   :  { %v1495_v61 = vpop.eup %1494 }
 0x31f   :  { %v546_v62 = vsel %vm144_vm2, %v1495_v61, 0.0 }
 0x321   :  { %318 = vrot.lane.b32.xlu1 %v1764_v10, %s1654_s19 }
 0x32e   :  { %204 = vrot.lane.b32.xlu0 %v1764_v10, %s1639_s7 }
 0x332   :  { %554 = vrot.lane.b32.xlu0 %v1764_v10, %s1655_s20 }
 0x345   :  { %547 = vadd.xlane.f32.xlu1 %v546_v62 }
 0x356   :  { %436 = vrot.lane.b32.xlu1 %v1764_v10, %s1656_s22 }
 0x395   :  { %v199_v63 = vpop.xlane.xlu0 %198 }
 0x396   :  { %1496 = vrcp.f32 %v199_v63 }
 0x39d   :  { %v312_v3 = vpop.xlane.xlu1 %311 }
 0x39e   :  { %1498 = vrcp.f32 %v312_v3 }
 0x3a0   :  { %v1497_v4 = vpop.eup %1496 }
 0x3a1   :  { %v201_v6 = vmul.f32 %v1497_v4, %v1489_v49  ;;  %v319_v13 = vpop.permute.xlu1 %318 }
 0x3a2   :  { %v324_v14 = vsel %vm209_vm3, %v319_v13, 0 }
 0x3a3   :  { %202 = vst.msk [vmem:[#allocation10] sm:$0xff] %vm144_vm2, %v201_v6  ;;  %v203_v10 = vpack.c.bf16 %v201_v6, %v201_v6  ;;  %v1910_v6 = vld [vmem:[%s1995_s4] ss:$0 sm:$0xff]  ;;  %s1659_s4 = smov [#allocation10]  }
 0x3a5   :  { %v430_v7 = vpop.xlane.xlu0 %429 }
 0x3a6   :  { %1500 = vrcp.f32 %v430_v7 }
 0x3a8   :  { %v1499_v8 = vpop.eup %1498 }
 0x3a9   :  { %v314_v9 = vmul.f32 %v1499_v8, %v1491_v54  ;;  %v205_v11 = vpop.permute.xlu0 %204 }
 0x3aa   :  { %v211_v12 = vsel %vm209_vm3, %v205_v11, 0 }
 0x3ab   :  { %316 = vst.msk [vmem:[#allocation10 + $0x8] sm:$0xff] %vm144_vm2, %v314_v9  ;;  %1348 = vmatpush3.bf16.msra.mxu0 %v211_v12  ;;  %v317_v17 = vpack.c.bf16 %v314_v9, %v314_v9 }
 0x3ac   :  { %1359 = vmatprep.subr.bf16.mxu0 %v1645_v0 }
 0x3ad   :  { %v555_v21 = vpop.permute.xlu0 %554 }
 0x3ae   :  { %1350 = vmatmul.mubr.msk.bf16.vlgmr.msra.gmra.mrb[4].mxu0 %vm144_vm2, %v203_v10  ;;  %v560_v23 = vsel %vm209_vm3, %v555_v21, 0 }
 0x3af   :  { %1360 = vmatpush3.bf16.msra.mxu0 %v324_v14  ;;  %1361 = vmatprep.mubr.msk.bf16.mxu0 %vm1646_vm0, %v1645_v0 }
 0x3b0   :  { %v1501_v15 = vpop.eup %1500  ;;  %1371 = vmatprep.subr.bf16.mxu0 %v1645_v0 }
 0x3b1   :  { %v432_v16 = vmul.f32 %v1501_v15, %v1493_v56 }
 0x3b3   :  { %434 = vst.msk [vmem:[#allocation10 + $0x10] sm:$0xff] %vm144_vm2, %v432_v16  ;;  %v435_v22 = vpack.c.bf16 %v432_v16, %v432_v16 }
 0x3b6   :  { %1362 = vmatmul.mubr.msk.bf16.vlgmr.msra.gmra.mrb[8].mxu0 %vm144_vm2, %v317_v17 }
 0x3b7   :  { %1373 = vmatprep.mubr.msk.bf16.mxu0 %vm1646_vm0, %v1645_v0 }
 0x3d2   :  { %v548_v18 = vpop.xlane.xlu1 %547 }
 0x3d3   :  { %1502 = vrcp.f32 %v548_v18 }
 0x3d6   :  { %v437_v19 = vpop.permute.xlu1 %436 }
 0x3d7   :  { %v442_v20 = vsel %vm209_vm3, %v437_v19, 0 }
 0x3d8   :  { %1372 = vmatpush3.bf16.msra.mxu0 %v442_v20 }
 0x3d9   :  { %1383 = vmatprep.subr.bf16.mxu0 %v1645_v0 }
 0x3db   :  { %1374 = vmatmul.mubr.msk.bf16.vlgmr.msra.gmra.mrb[12].mxu0 %vm144_vm2, %v435_v22 }
 0x3dc   :  { %1384 = vmatpush3.bf16.msra.mxu0 %v560_v23  ;;  %1385 = vmatprep.mubr.msk.bf16.mxu0 %vm1646_vm0, %v1645_v0 }
 0x3dd   :  { %v1503_v24 = vpop.eup %1502  ;;  %1397 = vmatprep.subr.bf16.mxu0 %v1645_v0 }
 0x3de   :  { %v550_v25 = vmul.f32 %v1503_v24, %v1495_v61 }
 0x3e0   :  { %552 = vst.msk [vmem:[#allocation10 + $0x18] sm:$0xff] %vm144_vm2, %v550_v25  ;;  %v553_v26 = vpack.c.bf16 %v550_v25, %v550_v25 }
 0x3e3   :  { %1386 = vmatmul.mubr.msk.bf16.vlgmr.msra.gmra.mrb[16].mxu0 %vm144_vm2, %v553_v26 }
 0x3e4   :  { %1398 = vmatpush3.bf16.msra.mxu0 %v1747_v1  ;;  %1401 = vmatprep.mubr.msk.bf16.mxu0 %vm1646_vm0, %v1645_v0 }
 0x3e5   :  { %1399 = vmatprep.subr.bf16.mxu0 %v1645_v0 }
 0x3e8   :  { %1400 = vmatpush3.bf16.msra.mxu0 %v1750_v2  ;;  %v1850_v2 = vld [vmem:[#allocation8] sm:$0xff]  }
 0x3e9   :  { %1411 = vmatprep.subr.bf16.mxu0 %v1645_v0  ;;  %1390 = vmatpush3.bf16.msra.mxu1 %v1850_v2 }
 0x3ea   :  { %1391 = vmatprep.subr.bf16.mxu1 %v1645_v0 }
 0x3eb   :  { %1402 = vmatmul.mubr.msk.bf16.vlgmr.msra.gmra.mrb[20].mxu0 %vm96_vm1, %v674_v28 }
 0x3ec   :  { %1413 = vmatprep.mubr.msk.bf16.mxu0 %vm1646_vm0, %v1645_v0 }
 0x3ed   :  { %1392 = vmatpush3.bf16.msra.mxu1 %v1853_v36 }
 0x3ee   :  { %1405 = vmatprep.subr.bf16.mxu1 %v1645_v0 }
 0x481   :  { %v247_v29 = vpop.f32.mrb[4].mxu0 }
 0x482   :  { %253 = vst.msk [vmem:[#allocation2] sm:$0xff] %vm144_vm2, %v247_v29  ;;  %v1351_v1 = vpop.f32.mrb[5].mxu0 }
 0x483   :  { %v250_v30 = vpop.f32.mrb[6].mxu0 }
 0x484   :  { %v1352_v31 = vpop.f32.mrb[7].mxu0 }
 0x489   :  { %v360_v32 = vpop.f32.mrb[8].mxu0 }
 0x48a   :  { %367 = vrot.lane.b32.xlu1 %v360_v32, %s1643_s21  ;;  %v1363_v33 = vpop.f32.mrb[9].mxu0 }
 0x48b   :  { %v363_v34 = vpop.f32.mrb[10].mxu0 }
 0x48c   :  { %v1364_v35 = vpop.f32.mrb[11].mxu0 }
 0x4ae   :  { %v478_v37 = vpop.f32.mrb[12].mxu0 }
 0x4af   :  { %485 = vrot.lane.b32.xlu0 %v478_v37, %s1657_s23  ;;  %v1375_v38 = vpop.f32.mrb[13].mxu0 }
 0x4b0   :  { %v481_v39 = vpop.f32.mrb[14].mxu0 }
 0x4b1   :  { %v1376_v40 = vpop.f32.mrb[15].mxu0 }
 0x4b6   :  { %v596_v41 = vpop.f32.mrb[16].mxu0 }
 0x4b7   :  { %603 = vrot.lane.b32.xlu1 %v596_v41, %s1658_s24  ;;  %v1387_v42 = vpop.f32.mrb[17].mxu0 }
 0x4b8   :  { %v599_v43 = vpop.f32.mrb[18].mxu0 }
 0x4b9   :  { %v1388_v44 = vpop.f32.mrb[19].mxu0 }
 0x4be   :  { %v712_v45 = vpop.f32.mrb[20].mxu0 }
 0x4bf   :  { %v713_v46 = vadd.f32 %v1761_v5, %v712_v45  ;;  %v1403_v47 = vpop.f32.mrb[21].mxu0 }
 0x4c0   :  { %v715_v48 = vpop.f32.mrb[22].mxu0 }
 0x4c1   :  { %v1861_v49 = vpack.c.bf16 %v713_v46, %v713_v46  ;;  %v1404_v50 = vpop.f32.mrb[23].mxu0 }
 0x4c3   :  { %833 = vrot.lane.b32.xlu1 %v1861_v49, %s1650_s2  ;;  %720 = vrot.lane.b32.xlu0 %v1861_v49, %s1648_s14 }
 0x4c7   :  { %950 = vrot.lane.b32.xlu1 %v1861_v49, %s1649_s15  ;;  %831 = vrot.lane.b32.xlu0 %v1861_v49, %s1647_s13 }
 0x4cb   :  { %1067 = vrot.lane.b32.xlu1 %v1861_v49, %s1651_s16  ;;  %948 = vrot.lane.b32.xlu0 %v1861_v49, %s1652_s17 }
 0x4cf   :  { %1065 = vrot.lane.b32.xlu0 %v1861_v49, %s1653_s18 }
 0x4fc   :  { %v368_v5 = vpop.permute.xlu1 %367 }
 0x4fd   :  { %371 = vst.msk [vmem:[#allocation2] sm:$0xff] %vm370_vm4, %v368_v5 }
 0x521   :  { %v486_v51 = vpop.permute.xlu0 %485 }
 0x522   :  { %489 = vst.msk [vmem:[#allocation2] sm:$0xff] %vm488_vm5, %v486_v51 }
 0x529   :  { %v604_v52 = vpop.permute.xlu1 %603 }
 0x52a   :  { %607 = vst.msk [vmem:[#allocation2] sm:$0xff] %vm606_vm6, %v604_v52 }
 0x531   :  { %v608_v53 = vld [vmem:[#allocation2] sm:$0xff] }
 0x532   :  { %v609_v54 = vpack.c.bf16 %v608_v53, %v608_v53 }
 0x534   :  { %1394 = vmatmul.mubr.msk.bf16.vlgmr.msra.gmra.mrb[16].mxu1 %vm96_vm1, %v609_v54 }
 0x535   :  { %v721_v55 = vpop.permute.xlu0 %720  ;;  %1407 = vmatprep.mubr.msk.bf16.mxu1 %vm1646_vm0, %v1645_v0  ;;  %v834_v57 = vpop.permute.xlu1 %833 }
 0x536   :  { %v726_v56 = vsel %vm144_vm2, %v721_v55, 0  ;;  %v839_v58 = vsel %vm144_vm2, %v834_v57, 0 }
 0x537   :  { %1406 = vmatpush3.bf16.xpose.msra.mxu1 %v726_v56 }
 0x538   :  { %1417 = vmatprep.subr.bf16.mxu1 %v1645_v0 }
 0x539   :  { %v951_v59 = vpop.permute.xlu1 %950  ;;  %v832_v60 = vpop.permute.xlu0 %831 }
 0x53a   :  { %v956_v61 = vsel %vm144_vm2, %v951_v59, 0 }
 0x53d   :  { %v1068_v62 = vpop.permute.xlu1 %1067  ;;  %v949_v63 = vpop.permute.xlu0 %948 }
 0x53e   :  { %1408 = vmatmul.mubr.msk.bf16.vlgmr.msra.gmra.mrb[20].mxu1 %vm144_vm2, %v1861_v49  ;;  %v1073_v3 = vsel %vm144_vm2, %v1068_v62, 0 }
 0x53f   :  { %1418 = vmatpush3.bf16.xpose.msra.mxu1 %v839_v58  ;;  %1419 = vmatprep.mubr.msk.bf16.mxu1 %vm1646_vm0, %v1645_v0 }
 0x540   :  { %1429 = vmatprep.subr.bf16.mxu1 %v1645_v0 }
 0x541   :  { %v1066_v4 = vpop.permute.xlu0 %1065 }
 0x546   :  { %1420 = vmatmul.mubr.msk.bf16.vlgmr.msra.gmra.mrb[24].mxu1 %vm144_vm2, %v832_v60 }
 0x547   :  { %1430 = vmatpush3.bf16.xpose.msra.mxu1 %v956_v61  ;;  %1431 = vmatprep.mubr.msk.bf16.mxu1 %vm1646_vm0, %v1645_v0 }
 0x548   :  { %1441 = vmatprep.subr.bf16.mxu1 %v1645_v0 }
 0x54e   :  { %1432 = vmatmul.mubr.msk.bf16.vlgmr.msra.gmra.mrb[28].mxu1 %vm144_vm2, %v949_v63 }
 0x54f   :  { %1442 = vmatpush3.bf16.xpose.msra.mxu1 %v1073_v3  ;;  %1443 = vmatprep.mubr.msk.bf16.mxu1 %vm1646_vm0, %v1645_v0 }
 0x550   :  { %1453 = vmatprep.subr.bf16.mxu1 %v1645_v0 }
 0x556   :  { %1444 = vmatmul.mubr.msk.bf16.vlgmr.msra.gmra.mrb[32].mxu1 %vm144_vm2, %v1066_v4 }
 0x557   :  { %1454 = vmatpush3.bf16.msra.mxu1 %v1850_v2  ;;  %1457 = vmatprep.mubr.msk.bf16.mxu1 %vm1646_vm0, %v1645_v0 }
 0x558   :  { %1455 = vmatprep.subr.bf16.mxu1 %v1645_v0 }
 0x55b   :  { %1456 = vmatpush3.bf16.msra.mxu1 %v1853_v36 }
 0x607   :  { %v665_v7 = vpop.f32.mrb[16].mxu1 }
 0x608   :  { %v666_v8 = vadd.f32 %v1910_v6, %v665_v7  ;;  %v1395_v9 = vpop.f32.mrb[17].mxu1 }
 0x609   :  { %v668_v11 = vpop.f32.mrb[18].mxu1 }
 0x60a   :  { %671 = vst.msk [vmem:[#allocation9] sm:$0xff] %vm96_vm1, %v666_v8  ;;  %v1396_v12 = vpop.f32.mrb[19].mxu1 }
 0x611   :  { %v762_v13 = vpop.f32.mrb[20].mxu1 }
 0x612   :  { %v1409_v10 = vpop.f32.mrb[21].mxu1  ;;  %v768_v14 = vsel %vm144_vm2, %v762_v13, -inf }
 0x613   :  { %769 = vmax.xlane.f32.xlu1 %v768_v14  ;;  %v765_v15 = vpop.f32.mrb[22].mxu1 }
 0x614   :  { %v1410_v16 = vpop.f32.mrb[23].mxu1 }
 0x619   :  { %v875_v17 = vpop.f32.mrb[24].mxu1 }
 0x61a   :  { %v1421_v18 = vpop.f32.mrb[25].mxu1  ;;  %v881_v19 = vsel %vm144_vm2, %v875_v17, -inf }
 0x61b   :  { %882 = vmax.xlane.f32.xlu0 %v881_v19  ;;  %v878_v20 = vpop.f32.mrb[26].mxu1 }
 0x61c   :  { %v1422_v21 = vpop.f32.mrb[27].mxu1 }
 0x621   :  { %v992_v22 = vpop.f32.mrb[28].mxu1 }
 0x622   :  { %v1433_v23 = vpop.f32.mrb[29].mxu1  ;;  %v998_v24 = vsel %vm144_vm2, %v992_v22, -inf }
 0x623   :  { %999 = vmax.xlane.f32.xlu0 %v998_v24  ;;  %v995_v25 = vpop.f32.mrb[30].mxu1 }
 0x624   :  { %v1434_v26 = vpop.f32.mrb[31].mxu1 }
 0x629   :  { %v1109_v27 = vpop.f32.mrb[32].mxu1 }
 0x62a   :  { %v1445_v28 = vpop.f32.mrb[33].mxu1  ;;  %v1115_v29 = vsel %vm144_vm2, %v1109_v27, -inf }
 0x62b   :  { %1116 = vmax.xlane.f32.xlu1 %v1115_v29  ;;  %v1112_v1 = vpop.f32.mrb[34].mxu1 }
 0x62c   :  { %v1446_v30 = vpop.f32.mrb[35].mxu1 }
 0x6a0   :  { %v770_v31 = vpop.xlane.xlu1 %769 }
 0x6a1   :  { %v771_v32 = vsub.f32 %v762_v13, %v770_v31 }
 0x6a3   :  { %v772_v33 = vmul.f32 1.442695, %v771_v32 }
 0x6a5   :  { %1504 = vpow2.f32 %v772_v33 }
 0x6a8   :  { %v883_v34 = vpop.xlane.xlu0 %882 }
 0x6a9   :  { %v884_v35 = vsub.f32 %v875_v17, %v883_v34 }
 0x6ab   :  { %v885_v2 = vmul.f32 1.442695, %v884_v35 }
 0x6ad   :  { %1506 = vpow2.f32 %v885_v2 }
 0x6af   :  { %v1505_v36 = vpop.eup %1504 }
 0x6b0   :  { %v1000_v37 = vpop.xlane.xlu0 %999  ;;  %v774_v38 = vsel %vm144_vm2, %v1505_v36, 0.0 }
 0x6b1   :  { %v1001_v39 = vsub.f32 %v992_v22, %v1000_v37  ;;  %775 = vadd.xlane.f32.xlu0 %v774_v38 }
 0x6b3   :  { %v1002_v40 = vmul.f32 1.442695, %v1001_v39 }
 0x6b5   :  { %1508 = vpow2.f32 %v1002_v40 }
 0x6b7   :  { %v1507_v41 = vpop.eup %1506 }
 0x6b8   :  { %v887_v42 = vsel %vm144_vm2, %v1507_v41, 0.0  ;;  %v1117_v45 = vpop.xlane.xlu1 %1116 }
 0x6b9   :  { %888 = vadd.xlane.f32.xlu1 %v887_v42  ;;  %v1118_v46 = vsub.f32 %v1109_v27, %v1117_v45 }
 0x6bb   :  { %v1119_v47 = vmul.f32 1.442695, %v1118_v46 }
 0x6bd   :  { %1510 = vpow2.f32 %v1119_v47 }
 0x6bf   :  { %v1509_v43 = vpop.eup %1508 }
 0x6c0   :  { %v1004_v44 = vsel %vm144_vm2, %v1509_v43, 0.0 }
 0x6c1   :  { %1005 = vadd.xlane.f32.xlu0 %v1004_v44 }
 0x6c7   :  { %v1511_v48 = vpop.eup %1510 }
 0x6c8   :  { %v1121_v50 = vsel %vm144_vm2, %v1511_v48, 0.0 }
 0x6ca   :  { %895 = vrot.lane.b32.xlu1 %v1861_v49, %s1654_s19 }
 0x6d7   :  { %782 = vrot.lane.b32.xlu0 %v1861_v49, %s1639_s7  ;;  %s1246_s7 = sshll.u32 %s1659_s4, 4  ;;  %s1247_s7 = int_to_ptr.vmem [resolvable:$true] %s1246_s7 }
 0x6d8   :  { %s1586_s27 = scalar_lea.vmem %s1247_s7, 1024  ;;  %p1591_p11 = scmp.lt.s32.totalorder %s1247_s7, %s1247_s7 }
 0x6d9   :  { %p1587_p10 = scmp.ne.s32.totalorder %s1247_s7, %s1586_s27  ;;  %p1592_p12 = scmp.lt.s32.totalorder %s1586_s27, %s1586_s27 }
 0x6db   :  { %1129 = vrot.lane.b32.xlu0 %v1861_v49, %s1655_s20  ;;  %p1593_p13 = por %p1592_p12, %p1591_p11 }
 0x6dd   :  { %p1594_p0 = pnand %p1593_p13, %p1587_p10 }
 0x6ee   :  { %1122 = vadd.xlane.f32.xlu1 %v1121_v50 }
 0x6ff   :  { %1012 = vrot.lane.b32.xlu1 %v1861_v49, %s1656_s22 }
 0x73e   :  { %v776_v5 = vpop.xlane.xlu0 %775 }
 0x73f   :  { %1512 = vrcp.f32 %v776_v5 }
 0x746   :  { %v889_v51 = vpop.xlane.xlu1 %888 }
 0x747   :  { %1514 = vrcp.f32 %v889_v51 }
 0x749   :  { %v1513_v52 = vpop.eup %1512 }
 0x74a   :  { %v778_v53 = vmul.f32 %v1513_v52, %v1505_v36  ;;  %v896_v59 = vpop.permute.xlu1 %895 }
 0x74b   :  { %v901_v60 = vsel %vm209_vm3, %v896_v59, 0 }
 0x74c   :  { %780 = vst.msk [vmem:[#allocation10 + $0x20] sm:$0xff] %vm144_vm2, %v778_v53  ;;  %v781_v49 = vpack.c.bf16 %v778_v53, %v778_v53 }
 0x74e   :  { %v1006_v54 = vpop.xlane.xlu0 %1005 }
 0x74f   :  { %1516 = vrcp.f32 %v1006_v54 }
 0x751   :  { %v1515_v55 = vpop.eup %1514 }
 0x752   :  { %v891_v56 = vmul.f32 %v1515_v55, %v1507_v41  ;;  %v783_v57 = vpop.permute.xlu0 %782 }
 0x753   :  { %v788_v58 = vsel %vm209_vm3, %v783_v57, 0 }
 0x754   :  { %893 = vst.msk [vmem:[#allocation10 + $0x28] sm:$0xff] %vm144_vm2, %v891_v56  ;;  %1412 = vmatpush3.bf16.msra.mxu0 %v788_v58  ;;  %v894_v63 = vpack.c.bf16 %v891_v56, %v891_v56 }
 0x755   :  { %1423 = vmatprep.subr.bf16.mxu0 %v1645_v0 }
 0x756   :  { %v1130_v8 = vpop.permute.xlu0 %1129 }
 0x757   :  { %1414 = vmatmul.mubr.msk.bf16.vlgmr.msra.gmra.mrb[24].mxu0 %vm144_vm2, %v781_v49  ;;  %v1135_v11 = vsel %vm209_vm3, %v1130_v8, 0 }
 0x758   :  { %1424 = vmatpush3.bf16.msra.mxu0 %v901_v60  ;;  %1425 = vmatprep.mubr.msk.bf16.mxu0 %vm1646_vm0, %v1645_v0 }
 0x759   :  { %v1517_v61 = vpop.eup %1516  ;;  %1435 = vmatprep.subr.bf16.mxu0 %v1645_v0 }
 0x75a   :  { %v1008_v62 = vmul.f32 %v1517_v61, %v1509_v43 }
 0x75c   :  { %1010 = vst.msk [vmem:[#allocation10 + $0x30] sm:$0xff] %vm144_vm2, %v1008_v62  ;;  %v1011_v9 = vpack.c.bf16 %v1008_v62, %v1008_v62 }
 0x75f   :  { %1426 = vmatmul.mubr.msk.bf16.vlgmr.msra.gmra.mrb[28].mxu0 %vm144_vm2, %v894_v63 }
 0x760   :  { %1437 = vmatprep.mubr.msk.bf16.mxu0 %vm1646_vm0, %v1645_v0 }
 0x77b   :  { %v1123_v3 = vpop.xlane.xlu1 %1122 }
 0x77c   :  { %1518 = vrcp.f32 %v1123_v3 }
 0x77f   :  { %v1013_v4 = vpop.permute.xlu1 %1012 }
 0x780   :  { %v1018_v7 = vsel %vm209_vm3, %v1013_v4, 0 }
 0x781   :  { %1436 = vmatpush3.bf16.msra.mxu0 %v1018_v7 }
 0x782   :  { %1447 = vmatprep.subr.bf16.mxu0 %v1645_v0 }
 0x784   :  { %1438 = vmatmul.mubr.msk.bf16.vlgmr.msra.gmra.mrb[32].mxu0 %vm144_vm2, %v1011_v9 }
 0x785   :  { %1448 = vmatpush3.bf16.msra.mxu0 %v1135_v11  ;;  %1449 = vmatprep.mubr.msk.bf16.mxu0 %vm1646_vm0, %v1645_v0 }
 0x786   :  { %v1519_v12 = vpop.eup %1518 }
 0x787   :  { %v1125_v13 = vmul.f32 %v1519_v12, %v1511_v48 }
 0x789   :  { %1127 = vst.msk [vmem:[#allocation10 + $0x38] sm:$0xff] %vm144_vm2, %v1125_v13  ;;  %v1128_v10 = vpack.c.bf16 %v1125_v13, %v1125_v13 }
 0x78c   :  { %1450 = vmatmul.mubr.msk.bf16.vlgmr.msra.gmra.mrb[36].mxu0 %vm144_vm2, %v1128_v10 }
 0x82a   :  { %v824_v14 = vpop.f32.mrb[24].mxu0 }
 0x82b   :  { %830 = vst.msk [vmem:[#allocation2] sm:$0xff] %vm144_vm2, %v824_v14  ;;  %v1415_v15 = vpop.f32.mrb[25].mxu0 }
 0x82c   :  { %v827_v16 = vpop.f32.mrb[26].mxu0 }
 0x82d   :  { %v1416_v17 = vpop.f32.mrb[27].mxu0 }
 0x832   :  { %v937_v18 = vpop.f32.mrb[28].mxu0 }
 0x833   :  { %944 = vrot.lane.b32.xlu1 %v937_v18, %s1643_s21  ;;  %v1427_v19 = vpop.f32.mrb[29].mxu0 }
 0x834   :  { %v940_v20 = vpop.f32.mrb[30].mxu0 }
 0x835   :  { %v1428_v21 = vpop.f32.mrb[31].mxu0 }
 0x857   :  { %v1054_v0 = vpop.f32.mrb[32].mxu0 }
 0x858   :  { %1061 = vrot.lane.b32.xlu0 %v1054_v0, %s1657_s23  ;;  %v1439_v22 = vpop.f32.mrb[33].mxu0 }
 0x859   :  { %v1057_v23 = vpop.f32.mrb[34].mxu0 }
 0x85a   :  { %v1440_v24 = vpop.f32.mrb[35].mxu0 }
 0x85f   :  { %v1171_v25 = vpop.f32.mrb[36].mxu0 }
 0x860   :  { %1178 = vrot.lane.b32.xlu1 %v1171_v25, %s1658_s24  ;;  %v1451_v26 = vpop.f32.mrb[37].mxu0 }
 0x861   :  { %v1174_v27 = vpop.f32.mrb[38].mxu0 }
 0x862   :  { %v1452_v28 = vpop.f32.mrb[39].mxu0 }
 0x8a5   :  { %v945_v29 = vpop.permute.xlu1 %944 }
 0x8a6   :  { %947 = vst.msk [vmem:[#allocation2] sm:$0xff] %vm370_vm4, %v945_v29 }
 0x8ca   :  { %v1062_v1 = vpop.permute.xlu0 %1061 }
 0x8cb   :  { %1064 = vst.msk [vmem:[#allocation2] sm:$0xff] %vm488_vm5, %v1062_v1 }
 0x8d2   :  { %v1179_v30 = vpop.permute.xlu1 %1178 }
 0x8d3   :  { %1181 = vst.msk [vmem:[#allocation2] sm:$0xff] %vm606_vm6, %v1179_v30 }
 0x8da   :  { %v1182_v31 = vld [vmem:[#allocation2] sm:$0xff] }
 0x8db   :  { %v1183_v32 = vpack.c.bf16 %v1182_v31, %v1182_v31 }
 0x8dd   :  { %1458 = vmatmul.mubr.msk.bf16.vlgmr.msra.gmra.mrb[36].mxu1 %vm96_vm1, %v1183_v32 }
 0x8de   :  { %1597 = shalt.err (!%p1594_p0)
}
 0x8df   :  { %s1598_s30 = scalar_lea.hbm %s1997_s6, 1024 }
 0x8e0   :  { %p1599_p1 = scmp.ne.s32.totalorder %s1997_s6, %s1598_s30  ;;  %p1602_p2 = scmp.lt.u32.totalorder %s1598_s30, %s1997_s6 }
 0x8e2   :  { %p1604_p3 = pnand %p1602_p2, %p1599_p1 }
 0x8e4   :  { %1607 = shalt.err (!%p1604_p3)
}
 0x8e5   :  { %1252 = dma.vmem_to_hbm [thread:$0]  %s1247_s7, 1024, %s1997_s6, [#allocation11], %s1642_s1, %s1642_s1, %s1643_s21  }
 0x8e6   :  { %s1660_s8 = smov [#allocation9]  }
 0x8e7   :  { %s1234_s13 = sshll.u32 %s1660_s8, 4  ;;  %s1235_s13 = int_to_ptr.vmem [resolvable:$true] %s1234_s13 }
 0x8e8   :  { %s1608_s14 = scalar_lea.vmem %s1235_s13, 256  ;;  %p1613_p5 = scmp.lt.s32.totalorder %s1235_s13, %s1235_s13 }
 0x8e9   :  { %p1609_p4 = scmp.ne.s32.totalorder %s1235_s13, %s1608_s14  ;;  %p1614_p6 = scmp.lt.s32.totalorder %s1608_s14, %s1608_s14 }
 0x8eb   :  { %p1615_p7 = por %p1614_p6, %p1613_p5 }
 0x8ed   :  { %p1616_p8 = pnand %p1615_p7, %p1609_p4 }
 0x9b0   :  { %v1221_v33 = vpop.f32.mrb[36].mxu1 }
 0x9b1   :  { %v1222_v34 = vadd.f32 %v1910_v6, %v1221_v33  ;;  %v1459_v35 = vpop.f32.mrb[37].mxu1 }
 0x9b2   :  { %v1224_v2 = vpop.f32.mrb[38].mxu1 }
 0x9b3   :  { %1228 = vst.msk [vmem:[#allocation9 + $0x8] sm:$0xff] %vm96_vm1, %v1222_v34  ;;  %v1460_v36 = vpop.f32.mrb[39].mxu1 }
 0x9b4   :  { %1619 = shalt.err (!%p1616_p8)
}
 0x9b5   :  { %s1620_s2 = scalar_lea.hbm %s1996_s5, 256 }
 0x9b6   :  { %p1621_p9 = scmp.ne.s32.totalorder %s1996_s5, %s1620_s2  ;;  %p1624_p10 = scmp.lt.u32.totalorder %s1620_s2, %s1996_s5 }
 0x9b8   :  { %p1626_p11 = pnand %p1624_p10, %p1621_p9 }
 0x9ba   :  { %1629 = shalt.err (!%p1626_p11)
}
 0x9bb   :  { %1240 = dma.vmem_to_hbm [thread:$0]  %s1235_s13, 256, %s1996_s5, [#allocation5], %s1642_s1, %s1642_s1, %s1643_s21  }
 0x9bc   :  { %1634 = dma.done.wait [#allocation5], 256  }
 0x9bd   :  { %1635 = vsyncadd [#allocation5], 4294967040 }
 0x9be   :  { %1636 = dma.done.wait [#allocation11], 1024  }
 0x9bf   :  { %1637 = vsyncadd [#allocation11], 4294966272 }
 0x9c0   :  { %1259 = vsyncpa [#allocation4], 1 }
 0x9c1   :  { %1260 = vsyncpa [#allocation7], 1 }
 0x9c2   :  { %1261 = vsyncpa [#allocation5], 1 }
 0x9c3   :  { %1262 = vsyncpa [#allocation11], 1 }

// kernel: tpu_custom_call.1
= control target key start
LH: loop header
LB: loop body
LE: loop exit
PB: predicated region body
PF: predicated region fallthrough
CT: control target
= control target key end

     0   :  { %12 = vsyncpa [#allocation4], 0  ;;  %s1991_s0 = inlined_call_operand.hbm [shape: f32[2,8,32], index: 0, kind: input, shape index: {}]   ;;  %s1992_s1 = inlined_call_operand.hbm [shape: bf16[32,96], index: 1, kind: input, shape index: {}]   ;;  %s1993_s2 = inlined_call_operand.vmem [shape: f32[1,96], index: 2, kind: input, shape index: {}]   ;;  %s1994_s3 = inlined_call_operand.hbm [shape: bf16[32,32], index: 3, kind: input, shape index: {}]   ;;  %s1995_s4 = inlined_call_operand.vmem [shape: f32[1,32], index: 4, kind: input, shape index: {}]   ;;  %s1996_s5 = inlined_call_operand.hbm [shape: f32[2,8,32], index: 5, kind: output, shape index: {0}]   ;;  %s1997_s6 = inlined_call_operand.hbm [shape: f32[2,4,8,8], index: 6, kind: output, shape index: {1}]  }
   0x1   :  { %13 = vsyncpa [#allocation7], 0 }
   0x2   :  { %14 = vsyncpa [#allocation5], 0 }
   0x3   :  { %15 = vsyncpa [#allocation11], 0  ;;  %s1638_s21 = smov [#allocation6]   ;;  %s1520_s25 = scalar_lea.hbm %s1992_s1, 256 }
   0x4   :  { %s33_s22 = sshll.u32 %s1638_s21, 4  ;;  %p1521_p0 = scmp.ne.s32.totalorder %s1992_s1, %s1520_s25  ;;  %s34_s22 = int_to_ptr.vmem [resolvable:$true] %s33_s22 }
   0x5   :  { %p1524_p1 = scmp.lt.u32.totalorder %s1520_s25, %s1992_s1 }
   0x7   :  { %p1526_p2 = pnand %p1524_p1, %p1521_p0 }
   0x9   :  { %1529 = shalt.err (!%p1526_p2)
}
   0xa   :  { %s1530_s30 = scalar_lea.vmem %s34_s22, 256  ;;  %p1535_p4 = scmp.lt.s32.totalorder %s34_s22, %s34_s22 }
   0xb   :  { %p1531_p3 = scmp.ne.s32.totalorder %s34_s22, %s1530_s30  ;;  %p1536_p5 = scmp.lt.s32.totalorder %s1530_s30, %s1530_s30 }
   0xd   :  { %p1537_p6 = por %p1536_p5, %p1535_p4 }
   0xf   :  { %p1538_p7 = pnand %p1537_p6, %p1531_p3 }
  0x11   :  { %1541 = shalt.err (!%p1538_p7)
}
  0x12   :  { %s1639_s7 = smov 64   ;;  %s1640_s8 = smov 4  }
  0x13   :  { %39 = dma.hbm_to_vmem [thread:$0]  %s1992_s1, 256, %s34_s22, [#allocation7], %s1639_s7, %s1639_s7, %s1640_s8  }
  0x14   :  { %s1641_s11 = smov [#allocation3]   ;;  %s1542_s15 = scalar_lea.hbm %s1991_s0, 256 }
  0x15   :  { %s21_s12 = sshll.u32 %s1641_s11, 4  ;;  %p1543_p8 = scmp.ne.s32.totalorder %s1991_s0, %s1542_s15  ;;  %s22_s12 = int_to_ptr.vmem [resolvable:$true] %s21_s12 }
  0x16   :  { %p1546_p9 = scmp.lt.u32.totalorder %s1542_s15, %s1991_s0 }
  0x18   :  { %p1548_p10 = pnand %p1546_p9, %p1543_p8 }
  0x1a   :  { %1551 = shalt.err (!%p1548_p10)
}
  0x1b   :  { %s1552_s20 = scalar_lea.vmem %s22_s12, 256  ;;  %p1557_p12 = scmp.lt.s32.totalorder %s22_s12, %s22_s12 }
  0x1c   :  { %p1553_p11 = scmp.ne.s32.totalorder %s22_s12, %s1552_s20  ;;  %p1558_p13 = scmp.lt.s32.totalorder %s1552_s20, %s1552_s20 }
  0x1e   :  { %p1559_p0 = por %p1558_p13, %p1557_p12 }
  0x20   :  { %p1560_p1 = pnand %p1559_p0, %p1553_p11 }
  0x22   :  { %1563 = shalt.err (!%p1560_p1)
}
  0x23   :  { %s1642_s1 = smov 128   ;;  %s1643_s21 = smov 8  }
  0x24   :  { %27 = dma.hbm_to_vmem [thread:$0]  %s1991_s0, 256, %s22_s12, [#allocation4], %s1642_s1, %s1642_s1, %s1643_s21  }
  0x25   :  { %s1644_s24 = smov [#allocation8]   ;;  %s1564_s28 = scalar_lea.hbm %s1994_s3, 256 }
  0x26   :  { %s47_s25 = sshll.u32 %s1644_s24, 4  ;;  %p1565_p2 = scmp.ne.s32.totalorder %s1994_s3, %s1564_s28  ;;  %s48_s25 = int_to_ptr.vmem [resolvable:$true] %s47_s25 }
  0x27   :  { %p1568_p3 = scmp.lt.u32.totalorder %s1564_s28, %s1994_s3 }
  0x29   :  { %p1570_p4 = pnand %p1568_p3, %p1565_p2 }
  0x2b   :  { %1573 = shalt.err (!%p1570_p4)
}
  0x2c   :  { %s1574_s11 = scalar_lea.vmem %s48_s25, 256  ;;  %p1579_p6 = scmp.lt.s32.totalorder %s48_s25, %s48_s25 }
  0x2d   :  { %p1575_p5 = scmp.ne.s32.totalorder %s48_s25, %s1574_s11  ;;  %p1580_p7 = scmp.lt.s32.totalorder %s1574_s11, %s1574_s11 }
  0x2f   :  { %p1581_p8 = por %p1580_p7, %p1579_p6 }
  0x31   :  { %p1582_p9 = pnand %p1581_p8, %p1575_p5 }
  0x33   :  { %1585 = shalt.err (!%p1582_p9)
}
  0x34   :  { %53 = dma.hbm_to_vmem [thread:$0]  %s1994_s3, 256, %s48_s25, [#allocation7], %s1639_s7, %s1639_s7, %s1640_s8  }
  0x35   :  { %1630 = dma.done.wait [#allocation4], 256  }
  0x36   :  { %1631 = vsyncadd [#allocation4], 4294967040 }
  0x37   :  { %1632 = dma.done.wait [#allocation7], 512  }
  0x38   :  { %1633 = vsyncadd [#allocation7], 4294966784  ;;  %v1645_v0 = vmov 0.0   ;;  %vm1646_vm0 = vmmov 0   ;;  %v1747_v1 = vld [vmem:[#allocation6] sm:$0xff]   ;;  %v1750_v2 = vld [vmem:[#allocation6 + $0x8] sm:$0xff]  }
  0x39   :  { %1333 = vmatprep.subr.bf16.mxu0 %v1645_v0  ;;  %1337 = vmatprep.mubr.msk.bf16.mxu0 %vm1646_vm0, %v1645_v0  ;;  %v76_v3 = vld [vmem:[#allocation3] sm:$0xff]  ;;  %vm96_vm1 = vcmask 261120   ;;  %v1761_v5 = vld [vmem:[%s1993_s2] ss:$0 sm:$0xff]  ;;  %s1647_s13 = smov 120   ;;  %s1648_s14 = smov 96  }
  0x3a   :  { %1341 = vmatprep.subr.bf16.mxu1 %v1645_v0  ;;  %1343 = vmatprep.mubr.msk.bf16.mxu1 %vm1646_vm0, %v1645_v0  ;;  %v77_v4 = vpack.c.bf16 %v76_v3, %v76_v3  ;;  %s1649_s15 = smov 80   ;;  %s1650_s2 = smov 88   ;;  %vm144_vm2 = vcmask 64512   ;;  %vm209_vm3 = vcmask 1043456   ;;  %vm370_vm4 = vcmask 130112  }
  0x3b   :  { %1334 = vmatpush3.bf16.msra.mxu0 %v1747_v1  ;;  %s1651_s16 = smov 72   ;;  %s1652_s17 = smov 112   ;;  %vm488_vm5 = vcmask 195712   ;;  %vm606_vm6 = vcmask 261312  }
  0x3c   :  { %1335 = vmatprep.subr.bf16.mxu0 %v1645_v0  ;;  %s1653_s18 = smov 104   ;;  %s1654_s19 = smov 56  }
  0x3d   :  { %s1655_s20 = smov 40   ;;  %s1656_s22 = smov 48  }
  0x3e   :  { %s1657_s23 = smov 16   ;;  %s1658_s24 = smov 24  }
  0x3f   :  { %1336 = vmatpush3.bf16.msra.mxu0 %v1750_v2 }
  0x40   :  { %1347 = vmatprep.subr.bf16.mxu0 %v1645_v0 }
  0x42   :  { %1338 = vmatmul.mubr.msk.bf16.vlgmr.msra.gmra.mrb[0].mxu0 %vm96_vm1, %v77_v4 }
  0x43   :  { %1349 = vmatprep.mubr.msk.bf16.mxu0 %vm1646_vm0, %v1645_v0 }
 0x115   :  { %v134_v6 = vpop.f32.mrb[0].mxu0 }
 0x116   :  { %v135_v7 = vadd.f32 %v1761_v5, %v134_v6  ;;  %v1339_v8 = vpop.f32.mrb[1].mxu0 }
 0x117   :  { %v137_v9 = vpop.f32.mrb[2].mxu0 }
 0x118   :  { %v1764_v10 = vpack.c.bf16 %v135_v7, %v135_v7  ;;  %v1340_v11 = vpop.f32.mrb[3].mxu0 }
 0x11a   :  { %254 = vrot.lane.b32.xlu1 %v1764_v10, %s1647_s13  ;;  %142 = vrot.lane.b32.xlu0 %v1764_v10, %s1648_s14 }
 0x11e   :  { %374 = vrot.lane.b32.xlu1 %v1764_v10, %s1649_s15  ;;  %256 = vrot.lane.b32.xlu0 %v1764_v10, %s1650_s2 }
 0x122   :  { %492 = vrot.lane.b32.xlu1 %v1764_v10, %s1651_s16  ;;  %372 = vrot.lane.b32.xlu0 %v1764_v10, %s1652_s17 }
 0x126   :  { %490 = vrot.lane.b32.xlu0 %v1764_v10, %s1653_s18 }
 0x18c   :  { %v143_v12 = vpop.permute.xlu0 %142  ;;  %v255_v15 = vpop.permute.xlu1 %254 }
 0x18d   :  { %v149_v13 = vsel %vm144_vm2, %v143_v12, 0 }
 0x18e   :  { %1342 = vmatpush3.bf16.xpose.msra.mxu1 %v149_v13 }
 0x18f   :  { %1353 = vmatprep.subr.bf16.mxu1 %v1645_v0 }
 0x190   :  { %v257_v14 = vpop.permute.xlu0 %256  ;;  %v375_v17 = vpop.permute.xlu1 %374 }
 0x191   :  { %v262_v16 = vsel %vm144_vm2, %v257_v14, 0  ;;  %v380_v18 = vsel %vm144_vm2, %v375_v17, 0 }
 0x194   :  { %v493_v19 = vpop.permute.xlu1 %492  ;;  %v373_v20 = vpop.permute.xlu0 %372 }
 0x195   :  { %1344 = vmatmul.mubr.msk.bf16.vlgmr.msra.gmra.mrb[0].mxu1 %vm144_vm2, %v1764_v10  ;;  %v498_v21 = vsel %vm144_vm2, %v493_v19, 0 }
 0x196   :  { %1354 = vmatpush3.bf16.xpose.msra.mxu1 %v262_v16  ;;  %1355 = vmatprep.mubr.msk.bf16.mxu1 %vm1646_vm0, %v1645_v0 }
 0x197   :  { %1365 = vmatprep.subr.bf16.mxu1 %v1645_v0 }
 0x198   :  { %v491_v22 = vpop.permute.xlu0 %490 }
 0x19d   :  { %1356 = vmatmul.mubr.msk.bf16.vlgmr.msra.gmra.mrb[4].mxu1 %vm144_vm2, %v255_v15 }
 0x19e   :  { %1366 = vmatpush3.bf16.xpose.msra.mxu1 %v380_v18  ;;  %1367 = vmatprep.mubr.msk.bf16.mxu1 %vm1646_vm0, %v1645_v0 }
 0x19f   :  { %1377 = vmatprep.subr.bf16.mxu1 %v1645_v0 }
 0x1a5   :  { %1368 = vmatmul.mubr.msk.bf16.vlgmr.msra.gmra.mrb[8].mxu1 %vm144_vm2, %v373_v20 }
 0x1a6   :  { %1378 = vmatpush3.bf16.xpose.msra.mxu1 %v498_v21  ;;  %1379 = vmatprep.mubr.msk.bf16.mxu1 %vm1646_vm0, %v1645_v0 }
 0x1a7   :  { %1389 = vmatprep.subr.bf16.mxu1 %v1645_v0 }
 0x1ad   :  { %1380 = vmatmul.mubr.msk.bf16.vlgmr.msra.gmra.mrb[12].mxu1 %vm144_vm2, %v491_v22 }
 0x1ae   :  { %1393 = vmatprep.mubr.msk.bf16.mxu1 %vm1646_vm0, %v1645_v0 }
 0x268   :  { %v185_v23 = vpop.f32.mrb[0].mxu1 }
 0x269   :  { %v1345_v24 = vpop.f32.mrb[1].mxu1  ;;  %v191_v25 = vsel %vm144_vm2, %v185_v23, -inf }
 0x26a   :  { %192 = vmax.xlane.f32.xlu1 %v191_v25  ;;  %v188_v26 = vpop.f32.mrb[2].mxu1 }
 0x26b   :  { %v1346_v27 = vpop.f32.mrb[3].mxu1 }
 0x26c   :  { %v673_v27 = vld [vmem:[#allocation3 + $0x8] sm:$0xff] }
 0x270   :  { %v298_v28 = vpop.f32.mrb[4].mxu1 }
 0x271   :  { %v1357_v29 = vpop.f32.mrb[5].mxu1  ;;  %v304_v30 = vsel %vm144_vm2, %v298_v28, -inf }
 0x272   :  { %305 = vmax.xlane.f32.xlu0 %v304_v30  ;;  %v301_v31 = vpop.f32.mrb[6].mxu1 }
 0x273   :  { %v1358_v32 = vpop.f32.mrb[7].mxu1 }
 0x278   :  { %v416_v33 = vpop.f32.mrb[8].mxu1 }
 0x279   :  { %v1369_v34 = vpop.f32.mrb[9].mxu1  ;;  %v422_v35 = vsel %vm144_vm2, %v416_v33, -inf }
 0x27a   :  { %423 = vmax.xlane.f32.xlu0 %v422_v35  ;;  %v419_v36 = vpop.f32.mrb[10].mxu1 }
 0x27b   :  { %v1370_v37 = vpop.f32.mrb[11].mxu1  ;;  %v1853_v36 = vld [vmem:[#allocation8 + $0x8] sm:$0xff]  }
 0x280   :  { %v534_v38 = vpop.f32.mrb[12].mxu1 }
 0x281   :  { %v1381_v39 = vpop.f32.mrb[13].mxu1  ;;  %v540_v40 = vsel %vm144_vm2, %v534_v38, -inf }
 0x282   :  { %541 = vmax.xlane.f32.xlu1 %v540_v40  ;;  %v537_v41 = vpop.f32.mrb[14].mxu1 }
 0x283   :  { %v1382_v42 = vpop.f32.mrb[15].mxu1 }
 0x2f7   :  { %v193_v43 = vpop.xlane.xlu1 %192 }
 0x2f8   :  { %v194_v44 = vsub.f32 %v185_v23, %v193_v43 }
 0x2fa   :  { %v195_v45 = vmul.f32 1.442695, %v194_v44 }
 0x2fc   :  { %1488 = vpow2.f32 %v195_v45 }
 0x2ff   :  { %v306_v46 = vpop.xlane.xlu0 %305 }
 0x300   :  { %v307_v47 = vsub.f32 %v298_v28, %v306_v46  ;;  %v674_v28 = vpack.c.bf16 %v673_v27, %v673_v27 }
 0x302   :  { %v308_v48 = vmul.f32 1.442695, %v307_v47 }
 0x304   :  { %1490 = vpow2.f32 %v308_v48 }
 0x306   :  { %v1489_v49 = vpop.eup %1488 }
 0x307   :  { %v424_v50 = vpop.xlane.xlu0 %423  ;;  %v197_v51 = vsel %vm144_vm2, %v1489_v49, 0.0 }
 0x308   :  { %v425_v52 = vsub.f32 %v416_v33, %v424_v50  ;;  %198 = vadd.xlane.f32.xlu0 %v197_v51 }
 0x30a   :  { %v426_v53 = vmul.f32 1.442695, %v425_v52 }
 0x30c   :  { %1492 = vpow2.f32 %v426_v53 }
 0x30e   :  { %v1491_v54 = vpop.eup %1490 }
 0x30f   :  { %v310_v55 = vsel %vm144_vm2, %v1491_v54, 0.0  ;;  %v542_v58 = vpop.xlane.xlu1 %541 }
 0x310   :  { %311 = vadd.xlane.f32.xlu1 %v310_v55  ;;  %v543_v59 = vsub.f32 %v534_v38, %v542_v58 }
 0x312   :  { %v544_v60 = vmul.f32 1.442695, %v543_v59 }
 0x314   :  { %1494 = vpow2.f32 %v544_v60 }
 0x316   :  { %v1493_v56 = vpop.eup %1492 }
 0x317   :  { %v428_v57 = vsel %vm144_vm2, %v1493_v56, 0.0 }
 0x318   :  { %429 = vadd.xlane.f32.xlu0 %v428_v57 }
 0x31e   :  { %v1495_v61 = vpop.eup %1494 }
 0x31f   :  { %v546_v62 = vsel %vm144_vm2, %v1495_v61, 0.0 }
 0x321   :  { %318 = vrot.lane.b32.xlu1 %v1764_v10, %s1654_s19 }
 0x32e   :  { %204 = vrot.lane.b32.xlu0 %v1764_v10, %s1639_s7 }
 0x332   :  { %554 = vrot.lane.b32.xlu0 %v1764_v10, %s1655_s20 }
 0x345   :  { %547 = vadd.xlane.f32.xlu1 %v546_v62 }
 0x356   :  { %436 = vrot.lane.b32.xlu1 %v1764_v10, %s1656_s22 }
 0x395   :  { %v199_v63 = vpop.xlane.xlu0 %198 }
 0x396   :  { %1496 = vrcp.f32 %v199_v63 }
 0x39d   :  { %v312_v3 = vpop.xlane.xlu1 %311 }
 0x39e   :  { %1498 = vrcp.f32 %v312_v3 }
 0x3a0   :  { %v1497_v4 = vpop.eup %1496 }
 0x3a1   :  { %v201_v6 = vmul.f32 %v1497_v4, %v1489_v49  ;;  %v319_v13 = vpop.permute.xlu1 %318 }
 0x3a2   :  { %v324_v14 = vsel %vm209_vm3, %v319_v13, 0 }
 0x3a3   :  { %202 = vst.msk [vmem:[#allocation10] sm:$0xff] %vm144_vm2, %v201_v6  ;;  %v203_v10 = vpack.c.bf16 %v201_v6, %v201_v6  ;;  %v1910_v6 = vld [vmem:[%s1995_s4] ss:$0 sm:$0xff]  ;;  %s1659_s4 = smov [#allocation10]  }
 0x3a5   :  { %v430_v7 = vpop.xlane.xlu0 %429 }
 0x3a6   :  { %1500 = vrcp.f32 %v430_v7 }
 0x3a8   :  { %v1499_v8 = vpop.eup %1498 }
 0x3a9   :  { %v314_v9 = vmul.f32 %v1499_v8, %v1491_v54  ;;  %v205_v11 = vpop.permute.xlu0 %204 }
 0x3aa   :  { %v211_v12 = vsel %vm209_vm3, %v205_v11, 0 }
 0x3ab   :  { %316 = vst.msk [vmem:[#allocation10 + $0x8] sm:$0xff] %vm144_vm2, %v314_v9  ;;  %1348 = vmatpush3.bf16.msra.mxu0 %v211_v12  ;;  %v317_v17 = vpack.c.bf16 %v314_v9, %v314_v9 }
 0x3ac   :  { %1359 = vmatprep.subr.bf16.mxu0 %v1645_v0 }
 0x3ad   :  { %v555_v21 = vpop.permute.xlu0 %554 }
 0x3ae   :  { %1350 = vmatmul.mubr.msk.bf16.vlgmr.msra.gmra.mrb[4].mxu0 %vm144_vm2, %v203_v10  ;;  %v560_v23 = vsel %vm209_vm3, %v555_v21, 0 }
 0x3af   :  { %1360 = vmatpush3.bf16.msra.mxu0 %v324_v14  ;;  %1361 = vmatprep.mubr.msk.bf16.mxu0 %vm1646_vm0, %v1645_v0 }
 0x3b0   :  { %v1501_v15 = vpop.eup %1500  ;;  %1371 = vmatprep.subr.bf16.mxu0 %v1645_v0 }
 0x3b1   :  { %v432_v16 = vmul.f32 %v1501_v15, %v1493_v56 }
 0x3b3   :  { %434 = vst.msk [vmem:[#allocation10 + $0x10] sm:$0xff] %vm144_vm2, %v432_v16  ;;  %v435_v22 = vpack.c.bf16 %v432_v16, %v432_v16 }
 0x3b6   :  { %1362 = vmatmul.mubr.msk.bf16.vlgmr.msra.gmra.mrb[8].mxu0 %vm144_vm2, %v317_v17 }
 0x3b7   :  { %1373 = vmatprep.mubr.msk.bf16.mxu0 %vm1646_vm0, %v1645_v0 }
 0x3d2   :  { %v548_v18 = vpop.xlane.xlu1 %547 }
 0x3d3   :  { %1502 = vrcp.f32 %v548_v18 }
 0x3d6   :  { %v437_v19 = vpop.permute.xlu1 %436 }
 0x3d7   :  { %v442_v20 = vsel %vm209_vm3, %v437_v19, 0 }
 0x3d8   :  { %1372 = vmatpush3.bf16.msra.mxu0 %v442_v20 }
 0x3d9   :  { %1383 = vmatprep.subr.bf16.mxu0 %v1645_v0 }
 0x3db   :  { %1374 = vmatmul.mubr.msk.bf16.vlgmr.msra.gmra.mrb[12].mxu0 %vm144_vm2, %v435_v22 }
 0x3dc   :  { %1384 = vmatpush3.bf16.msra.mxu0 %v560_v23  ;;  %1385 = vmatprep.mubr.msk.bf16.mxu0 %vm1646_vm0, %v1645_v0 }
 0x3dd   :  { %v1503_v24 = vpop.eup %1502  ;;  %1397 = vmatprep.subr.bf16.mxu0 %v1645_v0 }
 0x3de   :  { %v550_v25 = vmul.f32 %v1503_v24, %v1495_v61 }
 0x3e0   :  { %552 = vst.msk [vmem:[#allocation10 + $0x18] sm:$0xff] %vm144_vm2, %v550_v25  ;;  %v553_v26 = vpack.c.bf16 %v550_v25, %v550_v25 }
 0x3e3   :  { %1386 = vmatmul.mubr.msk.bf16.vlgmr.msra.gmra.mrb[16].mxu0 %vm144_vm2, %v553_v26 }
 0x3e4   :  { %1398 = vmatpush3.bf16.msra.mxu0 %v1747_v1  ;;  %1401 = vmatprep.mubr.msk.bf16.mxu0 %vm1646_vm0, %v1645_v0 }
 0x3e5   :  { %1399 = vmatprep.subr.bf16.mxu0 %v1645_v0 }
 0x3e8   :  { %1400 = vmatpush3.bf16.msra.mxu0 %v1750_v2  ;;  %v1850_v2 = vld [vmem:[#allocation8] sm:$0xff]  }
 0x3e9   :  { %1411 = vmatprep.subr.bf16.mxu0 %v1645_v0  ;;  %1390 = vmatpush3.bf16.msra.mxu1 %v1850_v2 }
 0x3ea   :  { %1391 = vmatprep.subr.bf16.mxu1 %v1645_v0 }
 0x3eb   :  { %1402 = vmatmul.mubr.msk.bf16.vlgmr.msra.gmra.mrb[20].mxu0 %vm96_vm1, %v674_v28 }
 0x3ec   :  { %1413 = vmatprep.mubr.msk.bf16.mxu0 %vm1646_vm0, %v1645_v0 }
 0x3ed   :  { %1392 = vmatpush3.bf16.msra.mxu1 %v1853_v36 }
 0x3ee   :  { %1405 = vmatprep.subr.bf16.mxu1 %v1645_v0 }
 0x481   :  { %v247_v29 = vpop.f32.mrb[4].mxu0 }
 0x482   :  { %253 = vst.msk [vmem:[#allocation2] sm:$0xff] %vm144_vm2, %v247_v29  ;;  %v1351_v1 = vpop.f32.mrb[5].mxu0 }
 0x483   :  { %v250_v30 = vpop.f32.mrb[6].mxu0 }
 0x484   :  { %v1352_v31 = vpop.f32.mrb[7].mxu0 }
 0x489   :  { %v360_v32 = vpop.f32.mrb[8].mxu0 }
 0x48a   :  { %367 = vrot.lane.b32.xlu1 %v360_v32, %s1643_s21  ;;  %v1363_v33 = vpop.f32.mrb[9].mxu0 }
 0x48b   :  { %v363_v34 = vpop.f32.mrb[10].mxu0 }
 0x48c   :  { %v1364_v35 = vpop.f32.mrb[11].mxu0 }
 0x4ae   :  { %v478_v37 = vpop.f32.mrb[12].mxu0 }
 0x4af   :  { %485 = vrot.lane.b32.xlu0 %v478_v37, %s1657_s23  ;;  %v1375_v38 = vpop.f32.mrb[13].mxu0 }
 0x4b0   :  { %v481_v39 = vpop.f32.mrb[14].mxu0 }
 0x4b1   :  { %v1376_v40 = vpop.f32.mrb[15].mxu0 }
 0x4b6   :  { %v596_v41 = vpop.f32.mrb[16].mxu0 }
 0x4b7   :  { %603 = vrot.lane.b32.xlu1 %v596_v41, %s1658_s24  ;;  %v1387_v42 = vpop.f32.mrb[17].mxu0 }
 0x4b8   :  { %v599_v43 = vpop.f32.mrb[18].mxu0 }
 0x4b9   :  { %v1388_v44 = vpop.f32.mrb[19].mxu0 }
 0x4be   :  { %v712_v45 = vpop.f32.mrb[20].mxu0 }
 0x4bf   :  { %v713_v46 = vadd.f32 %v1761_v5, %v712_v45  ;;  %v1403_v47 = vpop.f32.mrb[21].mxu0 }
 0x4c0   :  { %v715_v48 = vpop.f32.mrb[22].mxu0 }
 0x4c1   :  { %v1861_v49 = vpack.c.bf16 %v713_v46, %v713_v46  ;;  %v1404_v50 = vpop.f32.mrb[23].mxu0 }
 0x4c3   :  { %833 = vrot.lane.b32.xlu1 %v1861_v49, %s1650_s2  ;;  %720 = vrot.lane.b32.xlu0 %v1861_v49, %s1648_s14 }
 0x4c7   :  { %950 = vrot.lane.b32.xlu1 %v1861_v49, %s1649_s15  ;;  %831 = vrot.lane.b32.xlu0 %v1861_v49, %s1647_s13 }
 0x4cb   :  { %1067 = vrot.lane.b32.xlu1 %v1861_v49, %s1651_s16  ;;  %948 = vrot.lane.b32.xlu0 %v1861_v49, %s1652_s17 }
 0x4cf   :  { %1065 = vrot.lane.b32.xlu0 %v1861_v49, %s1653_s18 }
 0x4fc   :  { %v368_v5 = vpop.permute.xlu1 %367 }
 0x4fd   :  { %371 = vst.msk [vmem:[#allocation2] sm:$0xff] %vm370_vm4, %v368_v5 }
 0x521   :  { %v486_v51 = vpop.permute.xlu0 %485 }
 0x522   :  { %489 = vst.msk [vmem:[#allocation2] sm:$0xff] %vm488_vm5, %v486_v51 }
 0x529   :  { %v604_v52 = vpop.permute.xlu1 %603 }
 0x52a   :  { %607 = vst.msk [vmem:[#allocation2] sm:$0xff] %vm606_vm6, %v604_v52 }
 0x531   :  { %v608_v53 = vld [vmem:[#allocation2] sm:$0xff] }
 0x532   :  { %v609_v54 = vpack.c.bf16 %v608_v53, %v608_v53 }
 0x534   :  { %1394 = vmatmul.mubr.msk.bf16.vlgmr.msra.gmra.mrb[16].mxu1 %vm96_vm1, %v609_v54 }
 0x535   :  { %v721_v55 = vpop.permute.xlu0 %720  ;;  %1407 = vmatprep.mubr.msk.bf16.mxu1 %vm1646_vm0, %v1645_v0  ;;  %v834_v57 = vpop.permute.xlu1 %833 }
 0x536   :  { %v726_v56 = vsel %vm144_vm2, %v721_v55, 0  ;;  %v839_v58 = vsel %vm144_vm2, %v834_v57, 0 }
 0x537   :  { %1406 = vmatpush3.bf16.xpose.msra.mxu1 %v726_v56 }
 0x538   :  { %1417 = vmatprep.subr.bf16.mxu1 %v1645_v0 }
 0x539   :  { %v951_v59 = vpop.permute.xlu1 %950  ;;  %v832_v60 = vpop.permute.xlu0 %831 }
 0x53a   :  { %v956_v61 = vsel %vm144_vm2, %v951_v59, 0 }
 0x53d   :  { %v1068_v62 = vpop.permute.xlu1 %1067  ;;  %v949_v63 = vpop.permute.xlu0 %948 }
 0x53e   :  { %1408 = vmatmul.mubr.msk.bf16.vlgmr.msra.gmra.mrb[20].mxu1 %vm144_vm2, %v1861_v49  ;;  %v1073_v3 = vsel %vm144_vm2, %v1068_v62, 0 }
 0x53f   :  { %1418 = vmatpush3.bf16.xpose.msra.mxu1 %v839_v58  ;;  %1419 = vmatprep.mubr.msk.bf16.mxu1 %vm1646_vm0, %v1645_v0 }
 0x540   :  { %1429 = vmatprep.subr.bf16.mxu1 %v1645_v0 }
 0x541   :  { %v1066_v4 = vpop.permute.xlu0 %1065 }
 0x546   :  { %1420 = vmatmul.mubr.msk.bf16.vlgmr.msra.gmra.mrb[24].mxu1 %vm144_vm2, %v832_v60 }
 0x547   :  { %1430 = vmatpush3.bf16.xpose.msra.mxu1 %v956_v61  ;;  %1431 = vmatprep.mubr.msk.bf16.mxu1 %vm1646_vm0, %v1645_v0 }
 0x548   :  { %1441 = vmatprep.subr.bf16.mxu1 %v1645_v0 }
 0x54e   :  { %1432 = vmatmul.mubr.msk.bf16.vlgmr.msra.gmra.mrb[28].mxu1 %vm144_vm2, %v949_v63 }
 0x54f   :  { %1442 = vmatpush3.bf16.xpose.msra.mxu1 %v1073_v3  ;;  %1443 = vmatprep.mubr.msk.bf16.mxu1 %vm1646_vm0, %v1645_v0 }
 0x550   :  { %1453 = vmatprep.subr.bf16.mxu1 %v1645_v0 }
 0x556   :  { %1444 = vmatmul.mubr.msk.bf16.vlgmr.msra.gmra.mrb[32].mxu1 %vm144_vm2, %v1066_v4 }
 0x557   :  { %1454 = vmatpush3.bf16.msra.mxu1 %v1850_v2  ;;  %1457 = vmatprep.mubr.msk.bf16.mxu1 %vm1646_vm0, %v1645_v0 }
 0x558   :  { %1455 = vmatprep.subr.bf16.mxu1 %v1645_v0 }
 0x55b   :  { %1456 = vmatpush3.bf16.msra.mxu1 %v1853_v36 }
 0x607   :  { %v665_v7 = vpop.f32.mrb[16].mxu1 }
 0x608   :  { %v666_v8 = vadd.f32 %v1910_v6, %v665_v7  ;;  %v1395_v9 = vpop.f32.mrb[17].mxu1 }
 0x609   :  { %v668_v11 = vpop.f32.mrb[18].mxu1 }
 0x60a   :  { %671 = vst.msk [vmem:[#allocation9] sm:$0xff] %vm96_vm1, %v666_v8  ;;  %v1396_v12 = vpop.f32.mrb[19].mxu1 }
 0x611   :  { %v762_v13 = vpop.f32.mrb[20].mxu1 }
 0x612   :  { %v1409_v10 = vpop.f32.mrb[21].mxu1  ;;  %v768_v14 = vsel %vm144_vm2, %v762_v13, -inf }
 0x613   :  { %769 = vmax.xlane.f32.xlu1 %v768_v14  ;;  %v765_v15 = vpop.f32.mrb[22].mxu1 }
 0x614   :  { %v1410_v16 = vpop.f32.mrb[23].mxu1 }
 0x619   :  { %v875_v17 = vpop.f32.mrb[24].mxu1 }
 0x61a   :  { %v1421_v18 = vpop.f32.mrb[25].mxu1  ;;  %v881_v19 = vsel %vm144_vm2, %v875_v17, -inf }
 0x61b   :  { %882 = vmax.xlane.f32.xlu0 %v881_v19  ;;  %v878_v20 = vpop.f32.mrb[26].mxu1 }
 0x61c   :  { %v1422_v21 = vpop.f32.mrb[27].mxu1 }
 0x621   :  { %v992_v22 = vpop.f32.mrb[28].mxu1 }
 0x622   :  { %v1433_v23 = vpop.f32.mrb[29].mxu1  ;;  %v998_v24 = vsel %vm144_vm2, %v992_v22, -inf }
 0x623   :  { %999 = vmax.xlane.f32.xlu0 %v998_v24  ;;  %v995_v25 = vpop.f32.mrb[30].mxu1 }
 0x624   :  { %v1434_v26 = vpop.f32.mrb[31].mxu1 }
 0x629   :  { %v1109_v27 = vpop.f32.mrb[32].mxu1 }
 0x62a   :  { %v1445_v28 = vpop.f32.mrb[33].mxu1  ;;  %v1115_v29 = vsel %vm144_vm2, %v1109_v27, -inf }
 0x62b   :  { %1116 = vmax.xlane.f32.xlu1 %v1115_v29  ;;  %v1112_v1 = vpop.f32.mrb[34].mxu1 }
 0x62c   :  { %v1446_v30 = vpop.f32.mrb[35].mxu1 }
 0x6a0   :  { %v770_v31 = vpop.xlane.xlu1 %769 }
 0x6a1   :  { %v771_v32 = vsub.f32 %v762_v13, %v770_v31 }
 0x6a3   :  { %v772_v33 = vmul.f32 1.442695, %v771_v32 }
 0x6a5   :  { %1504 = vpow2.f32 %v772_v33 }
 0x6a8   :  { %v883_v34 = vpop.xlane.xlu0 %882 }
 0x6a9   :  { %v884_v35 = vsub.f32 %v875_v17, %v883_v34 }
 0x6ab   :  { %v885_v2 = vmul.f32 1.442695, %v884_v35 }
 0x6ad   :  { %1506 = vpow2.f32 %v885_v2 }
 0x6af   :  { %v1505_v36 = vpop.eup %1504 }
 0x6b0   :  { %v1000_v37 = vpop.xlane.xlu0 %999  ;;  %v774_v38 = vsel %vm144_vm2, %v1505_v36, 0.0 }
 0x6b1   :  { %v1001_v39 = vsub.f32 %v992_v22, %v1000_v37  ;;  %775 = vadd.xlane.f32.xlu0 %v774_v38 }
 0x6b3   :  { %v1002_v40 = vmul.f32 1.442695, %v1001_v39 }
 0x6b5   :  { %1508 = vpow2.f32 %v1002_v40 }
 0x6b7   :  { %v1507_v41 = vpop.eup %1506 }
 0x6b8   :  { %v887_v42 = vsel %vm144_vm2, %v1507_v41, 0.0  ;;  %v1117_v45 = vpop.xlane.xlu1 %1116 }
 0x6b9   :  { %888 = vadd.xlane.f32.xlu1 %v887_v42  ;;  %v1118_v46 = vsub.f32 %v1109_v27, %v1117_v45 }
 0x6bb   :  { %v1119_v47 = vmul.f32 1.442695, %v1118_v46 }
 0x6bd   :  { %1510 = vpow2.f32 %v1119_v47 }
 0x6bf   :  { %v1509_v43 = vpop.eup %1508 }
 0x6c0   :  { %v1004_v44 = vsel %vm144_vm2, %v1509_v43, 0.0 }
 0x6c1   :  { %1005 = vadd.xlane.f32.xlu0 %v1004_v44 }
 0x6c7   :  { %v1511_v48 = vpop.eup %1510 }
 0x6c8   :  { %v1121_v50 = vsel %vm144_vm2, %v1511_v48, 0.0 }
 0x6ca   :  { %895 = vrot.lane.b32.xlu1 %v1861_v49, %s1654_s19 }
 0x6d7   :  { %782 = vrot.lane.b32.xlu0 %v1861_v49, %s1639_s7  ;;  %s1246_s7 = sshll.u32 %s1659_s4, 4  ;;  %s1247_s7 = int_to_ptr.vmem [resolvable:$true] %s1246_s7 }
 0x6d8   :  { %s1586_s27 = scalar_lea.vmem %s1247_s7, 1024  ;;  %p1591_p11 = scmp.lt.s32.totalorder %s1247_s7, %s1247_s7 }
 0x6d9   :  { %p1587_p10 = scmp.ne.s32.totalorder %s1247_s7, %s1586_s27  ;;  %p1592_p12 = scmp.lt.s32.totalorder %s1586_s27, %s1586_s27 }
 0x6db   :  { %1129 = vrot.lane.b32.xlu0 %v1861_v49, %s1655_s20  ;;  %p1593_p13 = por %p1592_p12, %p1591_p11 }
 0x6dd   :  { %p1594_p0 = pnand %p1593_p13, %p1587_p10 }
 0x6ee   :  { %1122 = vadd.xlane.f32.xlu1 %v1121_v50 }
 0x6ff   :  { %1012 = vrot.lane.b32.xlu1 %v1861_v49, %s1656_s22 }
 0x73e   :  { %v776_v5 = vpop.xlane.xlu0 %775 }
 0x73f   :  { %1512 = vrcp.f32 %v776_v5 }
 0x746   :  { %v889_v51 = vpop.xlane.xlu1 %888 }
 0x747   :  { %1514 = vrcp.f32 %v889_v51 }
 0x749   :  { %v1513_v52 = vpop.eup %1512 }
 0x74a   :  { %v778_v53 = vmul.f32 %v1513_v52, %v1505_v36  ;;  %v896_v59 = vpop.permute.xlu1 %895 }
 0x74b   :  { %v901_v60 = vsel %vm209_vm3, %v896_v59, 0 }
 0x74c   :  { %780 = vst.msk [vmem:[#allocation10 + $0x20] sm:$0xff] %vm144_vm2, %v778_v53  ;;  %v781_v49 = vpack.c.bf16 %v778_v53, %v778_v53 }
 0x74e   :  { %v1006_v54 = vpop.xlane.xlu0 %1005 }
 0x74f   :  { %1516 = vrcp.f32 %v1006_v54 }
 0x751   :  { %v1515_v55 = vpop.eup %1514 }
 0x752   :  { %v891_v56 = vmul.f32 %v1515_v55, %v1507_v41  ;;  %v783_v57 = vpop.permute.xlu0 %782 }
 0x753   :  { %v788_v58 = vsel %vm209_vm3, %v783_v57, 0 }
 0x754   :  { %893 = vst.msk [vmem:[#allocation10 + $0x28] sm:$0xff] %vm144_vm2, %v891_v56  ;;  %1412 = vmatpush3.bf16.msra.mxu0 %v788_v58  ;;  %v894_v63 = vpack.c.bf16 %v891_v56, %v891_v56 }
 0x755   :  { %1423 = vmatprep.subr.bf16.mxu0 %v1645_v0 }
 0x756   :  { %v1130_v8 = vpop.permute.xlu0 %1129 }
 0x757   :  { %1414 = vmatmul.mubr.msk.bf16.vlgmr.msra.gmra.mrb[24].mxu0 %vm144_vm2, %v781_v49  ;;  %v1135_v11 = vsel %vm209_vm3, %v1130_v8, 0 }
 0x758   :  { %1424 = vmatpush3.bf16.msra.mxu0 %v901_v60  ;;  %1425 = vmatprep.mubr.msk.bf16.mxu0 %vm1646_vm0, %v1645_v0 }
 0x759   :  { %v1517_v61 = vpop.eup %1516  ;;  %1435 = vmatprep.subr.bf16.mxu0 %v1645_v0 }
 0x75a   :  { %v1008_v62 = vmul.f32 %v1517_v61, %v1509_v43 }
 0x75c   :  { %1010 = vst.msk [vmem:[#allocation10 + $0x30] sm:$0xff] %vm144_vm2, %v1008_v62  ;;  %v1011_v9 = vpack.c.bf16 %v1008_v62, %v1008_v62 }
 0x75f   :  { %1426 = vmatmul.mubr.msk.bf16.vlgmr.msra.gmra.mrb[28].mxu0 %vm144_vm2, %v894_v63 }
 0x760   :  { %1437 = vmatprep.mubr.msk.bf16.mxu0 %vm1646_vm0, %v1645_v0 }
 0x77b   :  { %v1123_v3 = vpop.xlane.xlu1 %1122 }
 0x77c   :  { %1518 = vrcp.f32 %v1123_v3 }
 0x77f   :  { %v1013_v4 = vpop.permute.xlu1 %1012 }
 0x780   :  { %v1018_v7 = vsel %vm209_vm3, %v1013_v4, 0 }
 0x781   :  { %1436 = vmatpush3.bf16.msra.mxu0 %v1018_v7 }
 0x782   :  { %1447 = vmatprep.subr.bf16.mxu0 %v1645_v0 }
 0x784   :  { %1438 = vmatmul.mubr.msk.bf16.vlgmr.msra.gmra.mrb[32].mxu0 %vm144_vm2, %v1011_v9 }
 0x785   :  { %1448 = vmatpush3.bf16.msra.mxu0 %v1135_v11  ;;  %1449 = vmatprep.mubr.msk.bf16.mxu0 %vm1646_vm0, %v1645_v0 }
 0x786   :  { %v1519_v12 = vpop.eup %1518 }
 0x787   :  { %v1125_v13 = vmul.f32 %v1519_v12, %v1511_v48 }
 0x789   :  { %1127 = vst.msk [vmem:[#allocation10 + $0x38] sm:$0xff] %vm144_vm2, %v1125_v13  ;;  %v1128_v10 = vpack.c.bf16 %v1125_v13, %v1125_v13 }
 0x78c   :  { %1450 = vmatmul.mubr.msk.bf16.vlgmr.msra.gmra.mrb[36].mxu0 %vm144_vm2, %v1128_v10 }
 0x82a   :  { %v824_v14 = vpop.f32.mrb[24].mxu0 }
 0x82b   :  { %830 = vst.msk [vmem:[#allocation2] sm:$0xff] %vm144_vm2, %v824_v14  ;;  %v1415_v15 = vpop.f32.mrb[25].mxu0 }
 0x82c   :  { %v827_v16 = vpop.f32.mrb[26].mxu0 }
 0x82d   :  { %v1416_v17 = vpop.f32.mrb[27].mxu0 }
 0x832   :  { %v937_v18 = vpop.f32.mrb[28].mxu0 }
 0x833   :  { %944 = vrot.lane.b32.xlu1 %v937_v18, %s1643_s21  ;;  %v1427_v19 = vpop.f32.mrb[29].mxu0 }
 0x834   :  { %v940_v20 = vpop.f32.mrb[30].mxu0 }
 0x835   :  { %v1428_v21 = vpop.f32.mrb[31].mxu0 }
 0x857   :  { %v1054_v0 = vpop.f32.mrb[32].mxu0 }
 0x858   :  { %1061 = vrot.lane.b32.xlu0 %v1054_v0, %s1657_s23  ;;  %v1439_v22 = vpop.f32.mrb[33].mxu0 }
 0x859   :  { %v1057_v23 = vpop.f32.mrb[34].mxu0 }
 0x85a   :  { %v1440_v24 = vpop.f32.mrb[35].mxu0 }
 0x85f   :  { %v1171_v25 = vpop.f32.mrb[36].mxu0 }
 0x860   :  { %1178 = vrot.lane.b32.xlu1 %v1171_v25, %s1658_s24  ;;  %v1451_v26 = vpop.f32.mrb[37].mxu0 }
 0x861   :  { %v1174_v27 = vpop.f32.mrb[38].mxu0 }
 0x862   :  { %v1452_v28 = vpop.f32.mrb[39].mxu0 }
 0x8a5   :  { %v945_v29 = vpop.permute.xlu1 %944 }
 0x8a6   :  { %947 = vst.msk [vmem:[#allocation2] sm:$0xff] %vm370_vm4, %v945_v29 }
 0x8ca   :  { %v1062_v1 = vpop.permute.xlu0 %1061 }
 0x8cb   :  { %1064 = vst.msk [vmem:[#allocation2] sm:$0xff] %vm488_vm5, %v1062_v1 }
 0x8d2   :  { %v1179_v30 = vpop.permute.xlu1 %1178 }
 0x8d3   :  { %1181 = vst.msk [vmem:[#allocation2] sm:$0xff] %vm606_vm6, %v1179_v30 }
 0x8da   :  { %v1182_v31 = vld [vmem:[#allocation2] sm:$0xff] }
 0x8db   :  { %v1183_v32 = vpack.c.bf16 %v1182_v31, %v1182_v31 }
 0x8dd   :  { %1458 = vmatmul.mubr.msk.bf16.vlgmr.msra.gmra.mrb[36].mxu1 %vm96_vm1, %v1183_v32 }
 0x8de   :  { %1597 = shalt.err (!%p1594_p0)
}
 0x8df   :  { %s1598_s30 = scalar_lea.hbm %s1997_s6, 1024 }
 0x8e0   :  { %p1599_p1 = scmp.ne.s32.totalorder %s1997_s6, %s1598_s30  ;;  %p1602_p2 = scmp.lt.u32.totalorder %s1598_s30, %s1997_s6 }
 0x8e2   :  { %p1604_p3 = pnand %p1602_p2, %p1599_p1 }
 0x8e4   :  { %1607 = shalt.err (!%p1604_p3)
}
 0x8e5   :  { %1252 = dma.vmem_to_hbm [thread:$0]  %s1247_s7, 1024, %s1997_s6, [#allocation11], %s1642_s1, %s1642_s1, %s1643_s21  }
 0x8e6   :  { %s1660_s8 = smov [#allocation9]  }
 0x8e7   :  { %s1234_s13 = sshll.u32 %s1660_s8, 4  ;;  %s1235_s13 = int_to_ptr.vmem [resolvable:$true] %s1234_s13 }
 0x8e8   :  { %s1608_s14 = scalar_lea.vmem %s1235_s13, 256  ;;  %p1613_p5 = scmp.lt.s32.totalorder %s1235_s13, %s1235_s13 }
 0x8e9   :  { %p1609_p4 = scmp.ne.s32.totalorder %s1235_s13, %s1608_s14  ;;  %p1614_p6 = scmp.lt.s32.totalorder %s1608_s14, %s1608_s14 }
 0x8eb   :  { %p1615_p7 = por %p1614_p6, %p1613_p5 }
 0x8ed   :  { %p1616_p8 = pnand %p1615_p7, %p1609_p4 }
 0x9b0   :  { %v1221_v33 = vpop.f32.mrb[36].mxu1 }
 0x9b1   :  { %v1222_v34 = vadd.f32 %v1910_v6, %v1221_v33  ;;  %v1459_v35 = vpop.f32.mrb[37].mxu1 }
 0x9b2   :  { %v1224_v2 = vpop.f32.mrb[38].mxu1 }
 0x9b3   :  { %1228 = vst.msk [vmem:[#allocation9 + $0x8] sm:$0xff] %vm96_vm1, %v1222_v34  ;;  %v1460_v36 = vpop.f32.mrb[39].mxu1 }
 0x9b4   :  { %1619 = shalt.err (!%p1616_p8)
}
 0x9b5   :  { %s1620_s2 = scalar_lea.hbm %s1996_s5, 256 }
 0x9b6   :  { %p1621_p9 = scmp.ne.s32.totalorder %s1996_s5, %s1620_s2  ;;  %p1624_p10 = scmp.lt.u32.totalorder %s1620_s2, %s1996_s5 }
 0x9b8   :  { %p1626_p11 = pnand %p1624_p10, %p1621_p9 }
 0x9ba   :  { %1629 = shalt.err (!%p1626_p11)
}
 0x9bb   :  { %1240 = dma.vmem_to_hbm [thread:$0]  %s1235_s13, 256, %s1996_s5, [#allocation5], %s1642_s1, %s1642_s1, %s1643_s21  }
 0x9bc   :  { %1634 = dma.done.wait [#allocation5], 256  }
 0x9bd   :  { %1635 = vsyncadd [#allocation5], 4294967040 }
 0x9be   :  { %1636 = dma.done.wait [#allocation11], 1024  }
 0x9bf   :  { %1637 = vsyncadd [#allocation11], 4294966272 }
 0x9c0   :  { %1259 = vsyncpa [#allocation4], 1 }
 0x9c1   :  { %1260 = vsyncpa [#allocation7], 1 }
 0x9c2   :  { %1261 = vsyncpa [#allocation5], 1 }
 0x9c3   :  { %1262 = vsyncpa [#allocation11], 1 }

</bundles_post_ra>
